<compile_context>
chip_gen: v7x
topology: tpu7x:2x2x1
jax: 0.10.0
libtpu: 0.0.40
codegen_flags: <defaults>
</compile_context>

<pallas_src>
import functools

import numpy as np
import jax
import jax.numpy as jnp
from jax import lax
from jax.experimental import pallas as pl
from jax.experimental.pallas import tpu as pltpu

K5 = 5   # embed_1 kernel size (5x5 "same" conv)
P5 = 2   # its padding


def _initial_embed_kernel(obs_ref, w1b_ref, e2b_ref, meta_ref, wmw_ref,
                          tile_ref, gath_ref, gamma_ref, beta_ref, y_ref,
                          *, N, H, W, C, eps):
    NH, WC = N * H, W * C
    WPF = obs_ref.shape[2]                 # (W + 4) * F

    # embed_1 (5x5 conv) with embed_3 ((1,W) row conv) folded into the centre band:
    # 5 banded bf16 MXU matmuls over the vertical taps, f32 accumulation.
    def band_dot(dy):
        lhs = obs_ref[:, pl.ds(dy, H), :].reshape(NH, WPF)       # (N*H, Wp*F) bf16
        return jnp.dot(lhs, w1b_ref[dy], preferred_element_type=jnp.float32)

    x = band_dot(0)
    for dy in range(1, K5):
        x = x + band_dot(dy)                                      # (N*H, W*C) f32

    # Per-sample terms: meta Linear (in-kernel matmul, f32) + embed_2 column conv
    # and all conv/linear biases (host-precomputed, f32).  Broadcast over H rows.
    per_n = e2b_ref[...] + jnp.dot(meta_ref[...], wmw_ref[...],
                                   preferred_element_type=jnp.float32)    # (N, W*C)
    x = x + jnp.broadcast_to(per_n[:, None, :], (N, H, WC)).reshape(NH, WC)

    # BatchNorm2d training-mode batch stats (two-pass, numerically robust) + ReLU.
    # Per-channel reductions / broadcasts over the (w, c) lane layout use tiny 0/1
    # matmuls (gath: (W*C, C) sums the w-groups, tile: (C, W*C) tiles a per-channel
    # row across w) -- no cross-tile reshapes required.
    inv = 1.0 / float(NH * W)
    gath = gath_ref[...]
    tile = tile_ref[...]
    mean_c = jnp.dot(jnp.sum(x, axis=0, keepdims=True), gath,
                     preferred_element_type=jnp.float32) * inv            # (1, C)
    d = x - jnp.dot(mean_c, tile, preferred_element_type=jnp.float32)
    var_c = jnp.dot(jnp.sum(d * d, axis=0, keepdims=True), gath,
                    preferred_element_type=jnp.float32) * inv             # (1, C)
    scale_c = gamma_ref[...] * lax.rsqrt(var_c + eps)                     # (1, C)
    scale = jnp.dot(scale_c, tile, preferred_element_type=jnp.float32)    # (1, W*C)
    shift = jnp.dot(beta_ref[...], tile, preferred_element_type=jnp.float32)
    y_ref[...] = jnp.maximum(d * scale + shift, 0.0)                      # lane-dense


def _vmem_limit_bytes():
    """Generation-aware VMEM budget (v5e/v6e: 128 MiB physical, v7x: 64 MiB)."""
    cap = None
    try:
        cap = int(getattr(pltpu.get_tpu_info(), "vmem_capacity_bytes", 0)) or None
    except Exception:
        cap = None
    if not cap:
        cap = 64 * 1024 * 1024            # conservative: assume v7x-sized VMEM
    return min((cap * 3) // 4, 100 * 1024 * 1024)


def prepare_params(params, H, W):
    """Init-time weight prep (hoisted out of the forward)."""
    C, F, k1h, k1w = params["w1"].shape
    assert (k1h, k1w) == (K5, K5), "embed_1 must be a 5x5 conv"
    kH = params["w2"].shape[2]
    kW = params["w3"].shape[3]
    if kH != H or kW != W:
        # The broadcast-add decomposition of embed_2/embed_3 is only valid for
        # full-extent row/column convs.
        raise ValueError(f"InitialEmbed kernel requires kH == H and kW == W "
                         f"(got kH={kH}, H={H}, kW={kW}, W={W})")
    M = params["wm"].shape[1]
    Wp = W + 2 * P5

    w1t = np.asarray(params["w1"], np.float32).transpose(2, 3, 1, 0)           # (5,5,F,C)
    w3t = np.asarray(params["w3"], np.float32)[:, :, 0, :].transpose(2, 1, 0)  # (W,F,C)

    # Banded RHS for the 5 vertical-tap matmuls: band[dy, (wp,f), (w,c)] =
    # w1[c,f,dy,wp-w] (0 outside the 5-wide band).  embed_3's (1,W) conv reads the
    # un-shifted rows (dy == P5) and is independent of the output w, so it folds
    # into that band (broadcast across output w) for free.
    band = np.zeros((K5, Wp, F, W, C), np.float32)
    for dx in range(K5):
        for w in range(W):
            band[:, w + dx, :, w, :] += w1t[:, dx, :, :]
    band[P5, P5:P5 + W, :, :, :] += w3t[:, :, None, :]
    w1band = jnp.asarray(band.reshape(K5, Wp * F, W * C), dtype=jnp.bfloat16)

    # embed_2 weight in (h', f, c) order for the host-side un-broadcast einsum.
    w2_hfc = jnp.asarray(
        np.asarray(params["w2"], np.float32)[:, :, :, 0].transpose(2, 1, 0))   # (H,F,C)

    # meta Linear weight pre-tiled across the W lane-groups; 0/1 tile / gather
    # matrices for per-channel broadcast / reduction over the (w, c) lane layout.
    wmT = np.asarray(params["wm"], np.float32).T                               # (M, C)
    wm_wide = jnp.asarray(np.tile(wmT, (1, W)))                                # (M, W*C)
    eye = np.eye(C, dtype=np.float32)
    tile_c = jnp.asarray(np.tile(eye, (1, W)))                                 # (C, W*C)
    gather_c = jnp.asarray(np.tile(eye, (1, W)).T)                             # (W*C, C)

    bias_all = (np.asarray(params["b1"], np.float32)
                + np.asarray(params["b2"], np.float32)
                + np.asarray(params["b3"], np.float32)
                + np.asarray(params["bm"], np.float32))                        # (C,)

    return dict(
        w1band=w1band,
        w2_hfc=w2_hfc,
        bias_all=jnp.asarray(bias_all),
        wm_wide=wm_wide,
        tile_c=tile_c,
        gather_c=gather_c,
        gamma=jnp.asarray(np.asarray(params["gamma"], np.float32).reshape(1, C)),
        beta=jnp.asarray(np.asarray(params["beta"], np.float32).reshape(1, C)),
        eps=float(params["eps"]),
    )


@functools.partial(jax.jit, static_argnames=("eps",))
def initial_embed_forward(obs, meta, w1band, w2_hfc, bias_all, wm_wide,
                          tile_c, gather_c, gamma, beta, *, eps):
    """obs: (N, H, W, F) f32 NHWC; meta: (N, M) f32 -> (N, H, W, C) f32."""
    N, H, W, F = obs.shape
    M = meta.shape[1]
    C = gamma.shape[-1]
    Hp, Wp = H + 2 * P5, W + 2 * P5
    NH, WC = N * H, W * C

    # ---- tiny host-side glue (the input is ~8 KiB; no large intermediates) ------
    obs_hpad = jnp.pad(obs, ((0, 0), (P5, P5), (P5, P5), (0, 0))) \
                  .reshape(N, Hp, Wp * F).astype(jnp.bfloat16)
    # embed_2 ((H,1) column conv) on the un-broadcast operand + all biases, f32.
    # TODO(synk): could move in-kernel, but its (n,w)-rows -> (w,c)-lanes relayout
    # has no clean Mosaic lowering; as one tiny einsum it fuses with the pad above.
    e2b = (jnp.einsum("nhwf,hfc->nwc", obs, w2_hfc,
                      precision=lax.Precision.HIGHEST)
           + bias_all).reshape(N, WC)

    vmem_limit = _vmem_limit_bytes()
    in_bytes = (obs_hpad.size * 2 + w1band.size * 2 + e2b.size * 4 + meta.size * 4
                + wm_wide.size * 4 + tile_c.size * 4 + gather_c.size * 4 + 2 * C * 4)
    resident = 2 * in_bytes + 2 * NH * WC * 4 + 4 * NH * WC * 4   # dbl-buffered io + x/d
    if resident > vmem_limit:
        # TODO(synk): tile N*H rows across a grid (and across v7x's two TensorCores)
        # with a two-pass BN for batches/resolutions beyond the VMEM-resident path.
        raise NotImplementedError("shape too large for the fused VMEM-resident kernel")

    kernel = functools.partial(_initial_embed_kernel, N=N, H=H, W=W, C=C, eps=eps)
    y = pl.pallas_call(
        kernel,
        grid=(1,),
        in_specs=[
            pl.BlockSpec((N, Hp, Wp * F), lambda i: (0, 0, 0)),
            pl.BlockSpec((K5, Wp * F, WC), lambda i: (0, 0, 0)),
            pl.BlockSpec((N, WC), lambda i: (0, 0)),
            pl.BlockSpec((N, M), lambda i: (0, 0)),
            pl.BlockSpec((M, WC), lambda i: (0, 0)),
            pl.BlockSpec((C, WC), lambda i: (0, 0)),
            pl.BlockSpec((WC, C), lambda i: (0, 0)),
            pl.BlockSpec((1, C), lambda i: (0, 0)),
            pl.BlockSpec((1, C), lambda i: (0, 0)),
        ],
        out_specs=pl.BlockSpec((NH, WC), lambda i: (0, 0)),
        out_shape=jax.ShapeDtypeStruct((NH, WC), jnp.float32),
        compiler_params=pltpu.CompilerParams(
            dimension_semantics=("arbitrary",),
            vmem_limit_bytes=vmem_limit,
        ),
    )(obs_hpad, w1band, e2b, meta, wm_wide, tile_c, gather_c, gamma, beta)

    return y.reshape(N, H, W, C)


def initial_embed_reference(obs, meta, p):
    """Pure-JAX reference (lax.conv) of the PyTorch forward, in NHWC."""
    hp = lax.Precision.HIGHEST
    dn = ('NHWC', 'HWIO', 'NHWC')
    w1 = jnp.transpose(p["w1"], (2, 3, 1, 0))       # (5,5,F,C)
    w2 = jnp.transpose(p["w2"], (2, 3, 1, 0))       # (H,1,F,C)
    w3 = jnp.transpose(p["w3"], (2, 3, 1, 0))       # (1,W,F,C)
    e1 = lax.conv_general_dilated(obs, w1, (1, 1), ((2, 2), (2, 2)),
                                  dimension_numbers=dn, precision=hp) + p["b1"]
    e2 = lax.conv_general_dilated(obs, w2, (1, 1), 'VALID',
                                  dimension_numbers=dn, precision=hp) + p["b2"]
    e3 = lax.conv_general_dilated(obs, w3, (1, 1), 'VALID',
                                  dimension_numbers=dn, precision=hp) + p["b3"]
    xm = meta @ p["wm"].T + p["bm"]
    x = e1 + e2 + e3 + xm[:, None, None, :]
    mean = jnp.mean(x, axis=(0, 1, 2))
    var = jnp.var(x, axis=(0, 1, 2))                # biased, matches BN forward
    y = (x - mean) / jnp.sqrt(var + p["eps"]) * p["gamma"] + p["beta"]
    return jnp.maximum(y, 0.0)


if __name__ == "__main__":
    # feats=4, meta_feats=8, channels=32, spatial 16x16, batch 2; kH=H, kW=W.
    N, F, C, M, H, W = 2, 4, 32, 8, 16, 16

    key = jax.random.PRNGKey(0)
    ks = jax.random.split(key, 12)
    params = dict(
        w1=0.1 * jax.random.normal(ks[0], (C, F, K5, K5), jnp.float32),
        b1=0.1 * jax.random.normal(ks[1], (C,), jnp.float32),
        w2=0.1 * jax.random.normal(ks[2], (C, F, H, 1), jnp.float32),
        b2=0.1 * jax.random.normal(ks[3], (C,), jnp.float32),
        w3=0.1 * jax.random.normal(ks[4], (C, F, 1, W), jnp.float32),
        b3=0.1 * jax.random.normal(ks[5], (C,), jnp.float32),
        wm=0.1 * jax.random.normal(ks[6], (C, M), jnp.float32),
        bm=0.1 * jax.random.normal(ks[7], (C,), jnp.float32),
        gamma=1.0 + 0.1 * jax.random.normal(ks[10], (C,), jnp.float32),
        beta=0.1 * jax.random.normal(ks[11], (C,), jnp.float32),
        eps=1e-5,
    )
    obs = jax.random.normal(ks[8], (N, H, W, F), jnp.float32)
    meta = jax.random.normal(ks[9], (N, M), jnp.float32)

    prep = prepare_params(params, H, W)              # init-time weight prep (hoisted)
    y = jax.block_until_ready(initial_embed_forward(
        obs, meta, prep["w1band"], prep["w2_hfc"], prep["bias_all"],
        prep["wm_wide"], prep["tile_c"], prep["gather_c"],
        prep["gamma"], prep["beta"], eps=prep["eps"]))
    y_ref = initial_embed_reference(obs, meta, params)

    assert y.shape == (N, H, W, C)
    err = float(jnp.max(jnp.abs(y - y_ref)))
    assert jnp.allclose(y, y_ref, atol=2e-2, rtol=2e-2), f"max abs err {err}"
    print("KERNEL_OK")
</pallas_src>

<mosaic_0001>
module attributes {stable_mosaic.version = 11 : i64} {
  func.func @_initial_embed_kernel(%arg0: i32, %arg1: memref<2x20x80xbf16, #tpu.memory_space<vmem>>, %arg2: memref<5x80x512xbf16, #tpu.memory_space<vmem>>, %arg3: memref<2x512xf32, #tpu.memory_space<vmem>>, %arg4: memref<2x8xf32, #tpu.memory_space<vmem>>, %arg5: memref<8x512xf32, #tpu.memory_space<vmem>>, %arg6: memref<32x512xf32, #tpu.memory_space<vmem>>, %arg7: memref<512x32xf32, #tpu.memory_space<vmem>>, %arg8: memref<1x32xf32, #tpu.memory_space<vmem>>, %arg9: memref<1x32xf32, #tpu.memory_space<vmem>>, %arg10: memref<32x512xf32, #tpu.memory_space<vmem>>) attributes {dimension_semantics = [#tpu.dimension_semantics<arbitrary>], iteration_bounds = array<i64: 1>, scalar_prefetch = 0 : i64, scratch_operands = 0 : i64, tpu.core_type = #tpu.core_type<tc>, window_params = [{pipeline_mode = #tpu.pipeline_mode<synchronous>, transform_indices = @transform_0, window_bounds = array<i64: 2, 20, 80>}, {pipeline_mode = #tpu.pipeline_mode<synchronous>, transform_indices = @transform_1, window_bounds = array<i64: 5, 80, 512>}, {pipeline_mode = #tpu.pipeline_mode<synchronous>, transform_indices = @transform_2, window_bounds = array<i64: 2, 512>}, {pipeline_mode = #tpu.pipeline_mode<synchronous>, transform_indices = @transform_3, window_bounds = array<i64: 2, 8>}, {pipeline_mode = #tpu.pipeline_mode<synchronous>, transform_indices = @transform_4, window_bounds = array<i64: 8, 512>}, {pipeline_mode = #tpu.pipeline_mode<synchronous>, transform_indices = @transform_5, window_bounds = array<i64: 32, 512>}, {pipeline_mode = #tpu.pipeline_mode<synchronous>, transform_indices = @transform_6, window_bounds = array<i64: 512, 32>}, {pipeline_mode = #tpu.pipeline_mode<synchronous>, transform_indices = @transform_7, window_bounds = array<i64: 1, 32>}, {pipeline_mode = #tpu.pipeline_mode<synchronous>, transform_indices = @transform_8, window_bounds = array<i64: 1, 32>}, {pipeline_mode = #tpu.pipeline_mode<synchronous>, transform_indices = @transform_9, window_bounds = array<i64: 32, 512>}]} {
    %c0 = arith.constant 0 : index
    %c0_0 = arith.constant 0 : index
    %c0_1 = arith.constant 0 : index
    %0 = vector.load %arg1[%c0, %c0_0, %c0_1] : memref<2x20x80xbf16, #tpu.memory_space<vmem>>, vector<2x16x80xbf16>
    %1 = vector.shape_cast %0 : vector<2x16x80xbf16> to vector<32x80xbf16>
    %c0_2 = arith.constant 0 : index
    %c0_3 = arith.constant 0 : index
    %c0_4 = arith.constant 0 : index
    %2 = vector.load %arg2[%c0_2, %c0_3, %c0_4] : memref<5x80x512xbf16, #tpu.memory_space<vmem>>, vector<1x80x512xbf16>
    %3 = vector.shape_cast %2 : vector<1x80x512xbf16> to vector<80x512xbf16>
    %cst = arith.constant dense<0.000000e+00> : vector<32x512xf32>
    %4 = tpu.matmul %1, %3, %cst {dimension_numbers = #tpu.dot_dimension_numbers<[1], [0], [0], [1], [0, 0, 1, 1], [], []>} : vector<32x80xbf16>, vector<80x512xbf16>, vector<32x512xf32> -> vector<32x512xf32>
    %c0_5 = arith.constant 0 : index
    %c1 = arith.constant 1 : index
    %c0_6 = arith.constant 0 : index
    %5 = vector.load %arg1[%c0_5, %c1, %c0_6] : memref<2x20x80xbf16, #tpu.memory_space<vmem>>, vector<2x16x80xbf16>
    %6 = vector.shape_cast %5 : vector<2x16x80xbf16> to vector<32x80xbf16>
    %c1_7 = arith.constant 1 : index
    %c0_8 = arith.constant 0 : index
    %c0_9 = arith.constant 0 : index
    %7 = vector.load %arg2[%c1_7, %c0_8, %c0_9] : memref<5x80x512xbf16, #tpu.memory_space<vmem>>, vector<1x80x512xbf16>
    %8 = vector.shape_cast %7 : vector<1x80x512xbf16> to vector<80x512xbf16>
    %cst_10 = arith.constant dense<0.000000e+00> : vector<32x512xf32>
    %9 = tpu.matmul %6, %8, %cst_10 {dimension_numbers = #tpu.dot_dimension_numbers<[1], [0], [0], [1], [0, 0, 1, 1], [], []>} : vector<32x80xbf16>, vector<80x512xbf16>, vector<32x512xf32> -> vector<32x512xf32>
    %10 = arith.addf %4, %9 : vector<32x512xf32>
    %c0_11 = arith.constant 0 : index
    %c2 = arith.constant 2 : index
    %c0_12 = arith.constant 0 : index
    %11 = vector.load %arg1[%c0_11, %c2, %c0_12] : memref<2x20x80xbf16, #tpu.memory_space<vmem>>, vector<2x16x80xbf16>
    %12 = vector.shape_cast %11 : vector<2x16x80xbf16> to vector<32x80xbf16>
    %c2_13 = arith.constant 2 : index
    %c0_14 = arith.constant 0 : index
    %c0_15 = arith.constant 0 : index
    %13 = vector.load %arg2[%c2_13, %c0_14, %c0_15] : memref<5x80x512xbf16, #tpu.memory_space<vmem>>, vector<1x80x512xbf16>
    %14 = vector.shape_cast %13 : vector<1x80x512xbf16> to vector<80x512xbf16>
    %cst_16 = arith.constant dense<0.000000e+00> : vector<32x512xf32>
    %15 = tpu.matmul %12, %14, %cst_16 {dimension_numbers = #tpu.dot_dimension_numbers<[1], [0], [0], [1], [0, 0, 1, 1], [], []>} : vector<32x80xbf16>, vector<80x512xbf16>, vector<32x512xf32> -> vector<32x512xf32>
    %16 = arith.addf %10, %15 : vector<32x512xf32>
    %c0_17 = arith.constant 0 : index
    %c3 = arith.constant 3 : index
    %c0_18 = arith.constant 0 : index
    %17 = vector.load %arg1[%c0_17, %c3, %c0_18] : memref<2x20x80xbf16, #tpu.memory_space<vmem>>, vector<2x16x80xbf16>
    %18 = vector.shape_cast %17 : vector<2x16x80xbf16> to vector<32x80xbf16>
    %c3_19 = arith.constant 3 : index
    %c0_20 = arith.constant 0 : index
    %c0_21 = arith.constant 0 : index
    %19 = vector.load %arg2[%c3_19, %c0_20, %c0_21] : memref<5x80x512xbf16, #tpu.memory_space<vmem>>, vector<1x80x512xbf16>
    %20 = vector.shape_cast %19 : vector<1x80x512xbf16> to vector<80x512xbf16>
    %cst_22 = arith.constant dense<0.000000e+00> : vector<32x512xf32>
    %21 = tpu.matmul %18, %20, %cst_22 {dimension_numbers = #tpu.dot_dimension_numbers<[1], [0], [0], [1], [0, 0, 1, 1], [], []>} : vector<32x80xbf16>, vector<80x512xbf16>, vector<32x512xf32> -> vector<32x512xf32>
    %22 = arith.addf %16, %21 : vector<32x512xf32>
    %c0_23 = arith.constant 0 : index
    %c4 = arith.constant 4 : index
    %c0_24 = arith.constant 0 : index
    %23 = vector.load %arg1[%c0_23, %c4, %c0_24] : memref<2x20x80xbf16, #tpu.memory_space<vmem>>, vector<2x16x80xbf16>
    %24 = vector.shape_cast %23 : vector<2x16x80xbf16> to vector<32x80xbf16>
    %c4_25 = arith.constant 4 : index
    %c0_26 = arith.constant 0 : index
    %c0_27 = arith.constant 0 : index
    %25 = vector.load %arg2[%c4_25, %c0_26, %c0_27] : memref<5x80x512xbf16, #tpu.memory_space<vmem>>, vector<1x80x512xbf16>
    %26 = vector.shape_cast %25 : vector<1x80x512xbf16> to vector<80x512xbf16>
    %cst_28 = arith.constant dense<0.000000e+00> : vector<32x512xf32>
    %27 = tpu.matmul %24, %26, %cst_28 {dimension_numbers = #tpu.dot_dimension_numbers<[1], [0], [0], [1], [0, 0, 1, 1], [], []>} : vector<32x80xbf16>, vector<80x512xbf16>, vector<32x512xf32> -> vector<32x512xf32>
    %28 = arith.addf %22, %27 : vector<32x512xf32>
    %c0_29 = arith.constant 0 : index
    %c0_30 = arith.constant 0 : index
    %29 = vector.load %arg3[%c0_29, %c0_30] : memref<2x512xf32, #tpu.memory_space<vmem>>, vector<2x512xf32>
    %c0_31 = arith.constant 0 : index
    %c0_32 = arith.constant 0 : index
    %30 = vector.load %arg4[%c0_31, %c0_32] : memref<2x8xf32, #tpu.memory_space<vmem>>, vector<2x8xf32>
    %c0_33 = arith.constant 0 : index
    %c0_34 = arith.constant 0 : index
    %31 = vector.load %arg5[%c0_33, %c0_34] : memref<8x512xf32, #tpu.memory_space<vmem>>, vector<8x512xf32>
    %cst_35 = arith.constant dense<0.000000e+00> : vector<2x512xf32>
    %32 = tpu.matmul %30, %31, %cst_35 {dimension_numbers = #tpu.dot_dimension_numbers<[1], [0], [0], [1], [0, 0, 1, 1], [], []>} : vector<2x8xf32>, vector<8x512xf32>, vector<2x512xf32> -> vector<2x512xf32>
    %33 = arith.addf %29, %32 : vector<2x512xf32>
    %34 = vector.shape_cast %33 : vector<2x512xf32> to vector<2x1x512xf32>
    %35 = vector.shape_cast %34 : vector<2x1x512xf32> to vector<2x1x512xf32>
    %36 = vector.broadcast %35 : vector<2x1x512xf32> to vector<2x16x512xf32>
    %37 = vector.shape_cast %36 : vector<2x16x512xf32> to vector<32x512xf32>
    %38 = arith.addf %28, %37 : vector<32x512xf32>
    %c0_36 = arith.constant 0 : index
    %c0_37 = arith.constant 0 : index
    %39 = vector.load %arg7[%c0_36, %c0_37] : memref<512x32xf32, #tpu.memory_space<vmem>>, vector<512x32xf32>
    %c0_38 = arith.constant 0 : index
    %c0_39 = arith.constant 0 : index
    %40 = vector.load %arg6[%c0_38, %c0_39] : memref<32x512xf32, #tpu.memory_space<vmem>>, vector<32x512xf32>
    %cst_40 = arith.constant dense<0.000000e+00> : vector<512xf32>
    %41 = vector.multi_reduction <add>, %38, %cst_40 [0] : vector<32x512xf32> to vector<512xf32>
    %42 = vector.shape_cast %41 : vector<512xf32> to vector<1x512xf32>
    %cst_41 = arith.constant dense<0.000000e+00> : vector<1x32xf32>
    %43 = tpu.matmul %42, %39, %cst_41 {dimension_numbers = #tpu.dot_dimension_numbers<[1], [0], [0], [1], [0, 0, 1, 1], [], []>} : vector<1x512xf32>, vector<512x32xf32>, vector<1x32xf32> -> vector<1x32xf32>
    %cst_42 = arith.constant 0.001953125 : f32
    %44 = vector.broadcast %cst_42 : f32 to vector<1x32xf32>
    %45 = arith.mulf %43, %44 : vector<1x32xf32>
    %cst_43 = arith.constant dense<0.000000e+00> : vector<1x512xf32>
    %46 = tpu.matmul %45, %40, %cst_43 {dimension_numbers = #tpu.dot_dimension_numbers<[1], [0], [0], [1], [0, 0, 1, 1], [], []>} : vector<1x32xf32>, vector<32x512xf32>, vector<1x512xf32> -> vector<1x512xf32>
    %47 = vector.broadcast %46 : vector<1x512xf32> to vector<32x512xf32>
    %48 = arith.subf %38, %47 : vector<32x512xf32>
    %49 = arith.mulf %48, %48 : vector<32x512xf32>
    %cst_44 = arith.constant dense<0.000000e+00> : vector<512xf32>
    %50 = vector.multi_reduction <add>, %49, %cst_44 [0] : vector<32x512xf32> to vector<512xf32>
    %51 = vector.shape_cast %50 : vector<512xf32> to vector<1x512xf32>
    %cst_45 = arith.constant dense<0.000000e+00> : vector<1x32xf32>
    %52 = tpu.matmul %51, %39, %cst_45 {dimension_numbers = #tpu.dot_dimension_numbers<[1], [0], [0], [1], [0, 0, 1, 1], [], []>} : vector<1x512xf32>, vector<512x32xf32>, vector<1x32xf32> -> vector<1x32xf32>
    %cst_46 = arith.constant 0.001953125 : f32
    %53 = vector.broadcast %cst_46 : f32 to vector<1x32xf32>
    %54 = arith.mulf %52, %53 : vector<1x32xf32>
    %c0_47 = arith.constant 0 : index
    %c0_48 = arith.constant 0 : index
    %55 = vector.load %arg8[%c0_47, %c0_48] : memref<1x32xf32, #tpu.memory_space<vmem>>, vector<1x32xf32>
    %cst_49 = arith.constant 9.99999974E-6 : f32
    %56 = vector.broadcast %cst_49 : f32 to vector<1x32xf32>
    %57 = arith.addf %54, %56 : vector<1x32xf32>
    %58 = math.rsqrt %57 : vector<1x32xf32>
    %59 = arith.mulf %55, %58 : vector<1x32xf32>
    %cst_50 = arith.constant dense<0.000000e+00> : vector<1x512xf32>
    %60 = tpu.matmul %59, %40, %cst_50 {dimension_numbers = #tpu.dot_dimension_numbers<[1], [0], [0], [1], [0, 0, 1, 1], [], []>} : vector<1x32xf32>, vector<32x512xf32>, vector<1x512xf32> -> vector<1x512xf32>
    %c0_51 = arith.constant 0 : index
    %c0_52 = arith.constant 0 : index
    %61 = vector.load %arg9[%c0_51, %c0_52] : memref<1x32xf32, #tpu.memory_space<vmem>>, vector<1x32xf32>
    %cst_53 = arith.constant dense<0.000000e+00> : vector<1x512xf32>
    %62 = tpu.matmul %61, %40, %cst_53 {dimension_numbers = #tpu.dot_dimension_numbers<[1], [0], [0], [1], [0, 0, 1, 1], [], []>} : vector<1x32xf32>, vector<32x512xf32>, vector<1x512xf32> -> vector<1x512xf32>
    %63 = vector.broadcast %60 : vector<1x512xf32> to vector<32x512xf32>
    %64 = arith.mulf %48, %63 : vector<32x512xf32>
    %65 = vector.broadcast %62 : vector<1x512xf32> to vector<32x512xf32>
    %66 = arith.addf %64, %65 : vector<32x512xf32>
    %cst_54 = arith.constant 0.000000e+00 : f32
    %67 = vector.broadcast %cst_54 : f32 to vector<32x512xf32>
    %68 = arith.maximumf %66, %67 : vector<32x512xf32>
    %c0_55 = arith.constant 0 : index
    %c0_56 = arith.constant 0 : index
    %69 = vector.load %arg10[%c0_55, %c0_56] : memref<32x512xf32, #tpu.memory_space<vmem>>, vector<32x512xf32>
    tpu.vector_store %arg10[%c0_55, %c0_56], %68 {strides = array<i32>} : memref<32x512xf32, #tpu.memory_space<vmem>>, vector<32x512xf32>,
    return
  }
  func.func @transform_0(%arg0: i32) -> (i32, i32, i32) {
    %c0_i32 = arith.constant 0 : i32
    %c0_i32_0 = arith.constant 0 : i32
    %c0_i32_1 = arith.constant 0 : i32
    %c0_i32_2 = arith.constant 0 : i32
    return %c0_i32, %c0_i32_0, %c0_i32_1 : i32, i32, i32
  }
  func.func @transform_1(%arg0: i32) -> (i32, i32, i32) {
    %c0_i32 = arith.constant 0 : i32
    %c0_i32_0 = arith.constant 0 : i32
    %c0_i32_1 = arith.constant 0 : i32
    %c0_i32_2 = arith.constant 0 : i32
    return %c0_i32, %c0_i32_0, %c0_i32_1 : i32, i32, i32
  }
  func.func @transform_2(%arg0: i32) -> (i32, i32) {
    %c0_i32 = arith.constant 0 : i32
    %c0_i32_0 = arith.constant 0 : i32
    %c0_i32_1 = arith.constant 0 : i32
    return %c0_i32, %c0_i32_0 : i32, i32
  }
  func.func @transform_3(%arg0: i32) -> (i32, i32) {
    %c0_i32 = arith.constant 0 : i32
    %c0_i32_0 = arith.constant 0 : i32
    %c0_i32_1 = arith.constant 0 : i32
    return %c0_i32, %c0_i32_0 : i32, i32
  }
  func.func @transform_4(%arg0: i32) -> (i32, i32) {
    %c0_i32 = arith.constant 0 : i32
    %c0_i32_0 = arith.constant 0 : i32
    %c0_i32_1 = arith.constant 0 : i32
    return %c0_i32, %c0_i32_0 : i32, i32
  }
  func.func @transform_5(%arg0: i32) -> (i32, i32) {
    %c0_i32 = arith.constant 0 : i32
    %c0_i32_0 = arith.constant 0 : i32
    %c0_i32_1 = arith.constant 0 : i32
    return %c0_i32, %c0_i32_0 : i32, i32
  }
  func.func @transform_6(%arg0: i32) -> (i32, i32) {
    %c0_i32 = arith.constant 0 : i32
    %c0_i32_0 = arith.constant 0 : i32
    %c0_i32_1 = arith.constant 0 : i32
    return %c0_i32, %c0_i32_0 : i32, i32
  }
  func.func @transform_7(%arg0: i32) -> (i32, i32) {
    %c0_i32 = arith.constant 0 : i32
    %c0_i32_0 = arith.constant 0 : i32
    %c0_i32_1 = arith.constant 0 : i32
    return %c0_i32, %c0_i32_0 : i32, i32
  }
  func.func @transform_8(%arg0: i32) -> (i32, i32) {
    %c0_i32 = arith.constant 0 : i32
    %c0_i32_0 = arith.constant 0 : i32
    %c0_i32_1 = arith.constant 0 : i32
    return %c0_i32, %c0_i32_0 : i32, i32
  }
  func.func @transform_9(%arg0: i32) -> (i32, i32) {
    %c0_i32 = arith.constant 0 : i32
    %c0_i32_0 = arith.constant 0 : i32
    %c0_i32_1 = arith.constant 0 : i32
    return %c0_i32, %c0_i32_0 : i32, i32
  }
}

</mosaic_0001>

<bundles_post_ra>
// kernel: initial_embed_forward.1
= control target key start
LH: loop header
LB: loop body
LE: loop exit
PB: predicated region body
PF: predicated region fallthrough
CT: control target
= control target key end

     0   :  { %v3457_v1 = vmov 0   ;;  %vm59_vm0 = vsmask.f32 3328  ;;  %vm60_vm1 = vsmask.f32 7440  ;;  %vm237_vm3 = vcmask 654336   ;;  %s4680_s1 = inlined_call_operand.vmem [shape: bf16[5,80,512], index: 1, kind: input, shape index: {}]   ;;  %s4681_s0 = inlined_call_operand.vmem [shape: bf16[2,20,80], index: 0, kind: input, shape index: {}]   ;;  %s4682_s4 = inlined_call_operand.vmem [shape: f32[8,512], index: 4, kind: input, shape index: {}]   ;;  %s4683_s3 = inlined_call_operand.vmem [shape: f32[2,8], index: 3, kind: input, shape index: {}]   ;;  %s4684_s6 = inlined_call_operand.vmem [shape: f32[512,32], index: 6, kind: input, shape index: {}]   ;;  %s4685_s2 = inlined_call_operand.vmem [shape: f32[2,512], index: 2, kind: input, shape index: {}]   ;;  %s4686_s5 = inlined_call_operand.vmem [shape: f32[32,512], index: 5, kind: input, shape index: {}]   ;;  %s4687_s7 = inlined_call_operand.vmem [shape: f32[1,32], index: 7, kind: input, shape index: {}]   ;;  %s4688_s8 = inlined_call_operand.vmem [shape: f32[1,32], index: 8, kind: input, shape index: {}]   ;;  %s4689_s9 = inlined_call_operand.vmem [shape: f32[32,512], index: 9, kind: output, shape index: {}]  }
   0x1   :  { %v3303_v0 = vld [vmem:[%s4680_s1 + $0xa4] ss:$16 sps:$4 sm:$0xff]   ;;  %276 = vmatprep.mubr.bf16.mxu0 %v3457_v1  ;;  %329 = vmatprep.mubr.bf16.mxu1 %v3457_v1  ;;  %v3305_v2 = vld [vmem:[%s4680_s1 + $0xac] ss:$16 sps:$4 sm:$0xff]   ;;  %v3307_v3 = vld [vmem:[%s4680_s1 + $0xa0] ss:$16 sps:$4 sm:$0xff]  }
   0x2   :  { %244 = vmatprep.subr.bf16.mxu0 %v3303_v0  ;;  %v3308_v4 = vld [vmem:[%s4680_s1 + $0xa8] ss:$16 sps:$4 sm:$0xff]   ;;  %297 = vmatprep.subr.bf16.mxu1 %v3305_v2  ;;  %v3309_v5 = vld [vmem:[%s4680_s1 + $0xc4] ss:$16 sps:$4 sm:$0xff]   ;;  %v3311_v6 = vld [vmem:[%s4680_s1 + $0xcc] ss:$16 sps:$4 sm:$0xff]  }
   0x3   :  { %245 = vmatpush1.bf16.msra.mxu0 %v3307_v3  ;;  %298 = vmatpush1.bf16.msra.mxu1 %v3308_v4  ;;  %v3313_v7 = vld [vmem:[%s4680_s1 + $0xc0] ss:$16 sps:$4 sm:$0xff]   ;;  %v3314_v8 = vld [vmem:[%s4680_s1 + $0xc8] ss:$16 sps:$4 sm:$0xff]   ;;  %v3315_v9 = vld [vmem:[%s4680_s1 + $0xe4] ss:$16 sps:$4 sm:$0xff]  }
   0x4   :  { %246 = vmatprep.subr.bf16.mxu0 %v3309_v5  ;;  %299 = vmatprep.subr.bf16.mxu1 %v3311_v6  ;;  %v3317_v10 = vld [vmem:[%s4680_s1 + $0xec] ss:$16 sps:$4 sm:$0xff]   ;;  %v3319_v11 = vld [vmem:[%s4680_s1 + $0xe0] ss:$16 sps:$4 sm:$0xff]   ;;  %v3320_v12 = vld [vmem:[%s4680_s1 + $0xe8] ss:$16 sps:$4 sm:$0xff]  }
   0x5   :  { %v3321_v13 = vld [vmem:[%s4680_s1 + $0x104] ss:$16 sps:$4 sm:$0xff]   ;;  %v3323_v14 = vld [vmem:[%s4680_s1 + $0x10c] ss:$16 sps:$4 sm:$0xff]   ;;  %v3325_v15 = vld [vmem:[%s4680_s1 + $0x100] ss:$16 sps:$4 sm:$0xff]  }
   0x6   :  { %v3326_v16 = vld [vmem:[%s4680_s1 + $0x108] ss:$16 sps:$4 sm:$0xff]   ;;  %v3327_v17 = vld [vmem:[%s4680_s1 + $0x124] ss:$16 sps:$4 sm:$0xff]   ;;  %v3329_v18 = vld [vmem:[%s4680_s1 + $0x12c] ss:$16 sps:$4 sm:$0xff]  }
   0x7   :  { %247 = vmatpush1.bf16.msra.mxu0 %v3313_v7  ;;  %300 = vmatpush1.bf16.msra.mxu1 %v3314_v8  ;;  %v3331_v19 = vld [vmem:[%s4680_s1 + $0x120] ss:$16 sps:$4 sm:$0xff]   ;;  %v3332_v20 = vld [vmem:[%s4680_s1 + $0x128] ss:$16 sps:$4 sm:$0xff]   ;;  %v3335_v21 = vld [vmem:[%s4680_s1 + $0x4] ss:$16 sps:$4 sm:$0xff]  }
   0x8   :  { %248 = vmatprep.subr.bf16.mxu0 %v3315_v9  ;;  %301 = vmatprep.subr.bf16.mxu1 %v3317_v10  ;;  %v3338_v22 = vld [vmem:[%s4680_s1 + $0xc] ss:$16 sps:$4 sm:$0xff]   ;;  %v3582_v23 = vld [vmem:[%s4681_s0] sm:$0xf]  ;;  %v3587_v24 = vld [vmem:[%s4681_s0 + $0x4] sm:$0xf] }
   0x9   :  { %v3592_v25 = vld [vmem:[%s4681_s0 + $0x8] sm:$0x1]  ;;  %v63_v26 = vshrl.u32 %v3582_v23, 16  ;;  %v66_v27 = vshll.u32 %v3582_v23, 16  ;;  %v72_v28 = vshll.u32 %v3587_v24, 16  ;;  %v76_v29 = vshrl.u32 %v3587_v24, 16  ;;  %vm3603_vm2 = vmor %vm59_vm0, %vm60_vm1 }
   0xa   :  { %v82_v30 = vshll.u32 %v3592_v25, 16  ;;  %v3333_v41 = vld [vmem:[%s4680_s1] ss:$16 sps:$4 sm:$0xff]   ;;  %v3336_v42 = vld [vmem:[%s4680_s1 + $0x8] ss:$16 sps:$4 sm:$0xff]   ;;  %vm578_vm4 = vcmask 1042432  }
   0xb   :  { %249 = vmatpush1.bf16.msra.mxu0 %v3319_v11  ;;  %302 = vmatpush1.bf16.msra.mxu1 %v3320_v12  ;;  %v65_v31 = vrot.slane %v63_v26, 4  ;;  %v68_v32 = vrot.slane %v66_v27, 5  ;;  %v74_v33 = vrot.slane %v72_v28, 5  ;;  %v78_v34 = vrot.slane %v76_v29, 4  ;;  %v3341_v46 = vld [vmem:[%s4680_s1 + $0x24] ss:$16 sps:$4 sm:$0xff]  }
   0xc   :  { %250 = vmatprep.subr.bf16.mxu0 %v3321_v13  ;;  %303 = vmatprep.subr.bf16.mxu1 %v3323_v14  ;;  %v84_v37 = vrot.slane %v82_v30, 5  ;;  %v3344_v47 = vld [vmem:[%s4680_s1 + $0x2c] ss:$16 sps:$4 sm:$0xff]   ;;  %v3339_v49 = vld [vmem:[%s4680_s1 + $0x20] ss:$16 sps:$4 sm:$0xff]   ;;  %vm579_vm5 = vcmask 1046532  }
   0xd   :  { %v69_v35 = vor.u32 %v68_v32, %v65_v31  ;;  %v79_v36 = vor.u32 %v78_v34, %v74_v33  ;;  %v3626_v48 = vld [vmem:[%s4681_s0 + $0xc] sm:$0xf]  ;;  %v3634_v50 = vld [vmem:[%s4681_s0 + $0x10] sm:$0xf]  ;;  %v3639_v51 = vld [vmem:[%s4681_s0 + $0x14] sm:$0x1] }
   0xe   :  { %v87_v52 = vshrl.u32 %v3626_v48, 16  ;;  %v90_v53 = vshll.u32 %v3626_v48, 16  ;;  %v96_v54 = vshll.u32 %v3634_v50, 16  ;;  %v100_v55 = vshrl.u32 %v3634_v50, 16  ;;  %v3342_v57 = vld [vmem:[%s4680_s1 + $0x28] ss:$16 sps:$4 sm:$0xff]   ;;  %vm3755_vm6 = vmor %vm578_vm4, %vm579_vm5 }
   0xf   :  { %251 = vmatpush1.bf16.msra.mxu0 %v3325_v15  ;;  %304 = vmatpush1.bf16.msra.mxu1 %v3326_v16  ;;  %v70_v39 = vrot.slane %v69_v35, 4  ;;  %v80_v40 = vrot.slane %v79_v36, 4  ;;  %v106_v56 = vshll.u32 %v3639_v51, 16  ;;  %v3347_v58 = vld [vmem:[%s4680_s1 + $0x44] ss:$16 sps:$4 sm:$0xff]   ;;  %vm1162_vm7 = vcmask 1041408  }
  0x10   :  { %252 = vmatprep.subr.bf16.mxu0 %v3327_v17  ;;  %305 = vmatprep.subr.bf16.mxu1 %v3329_v18  ;;  %v89_v59 = vrot.slane %v87_v52, 4  ;;  %v92_v60 = vrot.slane %v90_v53, 5  ;;  %v3350_v61 = vld [vmem:[%s4680_s1 + $0x4c] ss:$16 sps:$4 sm:$0xff]   ;;  %v98_v62 = vrot.slane %v96_v54, 5  ;;  %v102_v63 = vrot.slane %v100_v55, 4 }
  0x11   :  { %v75_v43 = vsel %vm3603_vm2, %v70_v39, %v74_v33  ;;  %v85_v44 = vsel %vm3603_vm2, %v80_v40, %v84_v37  ;;  %v3345_v2 = vld [vmem:[%s4680_s1 + $0x40] ss:$16 sps:$4 sm:$0xff]   ;;  %v108_v4 = vrot.slane %v106_v56, 5  ;;  %v3348_v5 = vld [vmem:[%s4680_s1 + $0x48] ss:$16 sps:$4 sm:$0xff]   ;;  %v2744_v37 = vcombine.low %v3626_v48, %v3634_v50 }
  0x12   :  { %v2717_v45 = vcombine.low %v75_v43, %v85_v44  ;;  %v93_v0 = vor.u32 %v92_v60, %v89_v59  ;;  %v103_v3 = vor.u32 %v102_v63, %v98_v62  ;;  %v3353_v6 = vld [vmem:[%s4680_s1 + $0x64] ss:$16 sps:$4 sm:$0xff]   ;;  %v3356_v8 = vld [vmem:[%s4680_s1 + $0x6c] ss:$16 sps:$4 sm:$0xff]   ;;  %v3351_v11 = vld [vmem:[%s4680_s1 + $0x60] ss:$16 sps:$4 sm:$0xff]  }
  0x13   :  { %253 = vmatpush1.bf16.msra.mxu0 %v3331_v19  ;;  %306 = vmatpush1.bf16.msra.mxu1 %v3332_v20  ;;  %v3354_v13 = vld [vmem:[%s4680_s1 + $0x68] ss:$16 sps:$4 sm:$0xff]   ;;  %v3359_v15 = vld [vmem:[%s4680_s1 + $0x84] ss:$16 sps:$4 sm:$0xff]   ;;  %v3362_v16 = vld [vmem:[%s4680_s1 + $0x8c] ss:$16 sps:$4 sm:$0xff]  }
  0x14   :  { %466 = vmatprep.subr.bf16.mxu0 %v3335_v21  ;;  %519 = vmatprep.subr.bf16.mxu1 %v3338_v22  ;;  %v94_v7 = vrot.slane %v93_v0, 4  ;;  %v104_v9 = vrot.slane %v103_v3, 4  ;;  %v3357_v17 = vld [vmem:[%s4680_s1 + $0x80] ss:$16 sps:$4 sm:$0xff]   ;;  %v3360_v18 = vld [vmem:[%s4680_s1 + $0x88] ss:$16 sps:$4 sm:$0xff]   ;;  %v2743_v22 = vcombine.low %v3582_v23, %v3587_v24 }
  0x15   :  { %v3365_v19 = vld [vmem:[%s4680_s1 + $0x144] ss:$16 sps:$4 sm:$0xff]   ;;  %v3368_v20 = vld [vmem:[%s4680_s1 + $0x14c] ss:$16 sps:$4 sm:$0xff]   ;;  %v3363_v21 = vld [vmem:[%s4680_s1 + $0x140] ss:$16 sps:$4 sm:$0xff]  }
  0x16   :  { %2739 = vmatmul.mubr.msk.bf16.vlgmr.msra.gmra.mrb[0].mxu0 %vm237_vm3, %v2717_v45  ;;  %2741 = vmatmul.mubr.msk.bf16.vlgmr.msra.gmra.mrb[0].mxu1 %vm237_vm3, %v2717_v45  ;;  %v99_v10 = vsel %vm3603_vm2, %v94_v7, %v98_v62  ;;  %v109_v12 = vsel %vm3603_vm2, %v104_v9, %v108_v4  ;;  %v3366_v26 = vld [vmem:[%s4680_s1 + $0x148] ss:$16 sps:$4 sm:$0xff]   ;;  %v3372_v27 = vld [vmem:[%s4680_s1 + $0x164] ss:$16 sps:$4 sm:$0xff]   ;;  %v3375_v30 = vld [vmem:[%s4680_s1 + $0x16c] ss:$16 sps:$4 sm:$0xff]  }
  0x17   :  { %467 = vmatpush1.bf16.msra.mxu0 %v3333_v41  ;;  %520 = vmatpush1.bf16.msra.mxu1 %v3336_v42  ;;  %v2718_v14 = vcombine.low %v99_v10, %v109_v12  ;;  %v3370_v23 = vld [vmem:[%s4680_s1 + $0x160] ss:$16 sps:$4 sm:$0xff]   ;;  %v3373_v31 = vld [vmem:[%s4680_s1 + $0x168] ss:$16 sps:$4 sm:$0xff]   ;;  %v3378_v32 = vld [vmem:[%s4680_s1 + $0x184] ss:$16 sps:$4 sm:$0xff]  }
  0x18   :  { %468 = vmatprep.subr.bf16.mxu0 %v3341_v46  ;;  %521 = vmatprep.subr.bf16.mxu1 %v3344_v47  ;;  %v3381_v33 = vld [vmem:[%s4680_s1 + $0x18c] ss:$16 sps:$4 sm:$0xff]   ;;  %v3376_v34 = vld [vmem:[%s4680_s1 + $0x180] ss:$16 sps:$4 sm:$0xff]   ;;  %v3379_v35 = vld [vmem:[%s4680_s1 + $0x188] ss:$16 sps:$4 sm:$0xff]  }
  0x19   :  { %286 = vmatprep.mubr.bf16.mxu0 %v3457_v1  ;;  %339 = vmatprep.mubr.bf16.mxu1 %v3457_v1  ;;  %v3384_v36 = vld [vmem:[%s4680_s1 + $0x1a4] ss:$16 sps:$4 sm:$0xff]   ;;  %v3387_v38 = vld [vmem:[%s4680_s1 + $0x1ac] ss:$16 sps:$4 sm:$0xff]   ;;  %v583_v39 = vrot.slane %v3587_v24, 5  ;;  %v586_v42 = vrot.slane %v3592_v25, 5 }
  0x1a   :  { %v572_v40 = vld [vmem:[%s4681_s0] sm:$0xe]  ;;  %v3385_v44 = vld [vmem:[%s4680_s1 + $0x1a8] ss:$16 sps:$4 sm:$0xff]   ;;  %v3391_v25 = vld [vmem:[%s4680_s1 + $0x1c4] ss:$16 sps:$4 sm:$0xff]  }
  0x1b   :  { %469 = vmatpush1.bf16.msra.mxu0 %v3339_v49  ;;  %522 = vmatpush1.bf16.msra.mxu1 %v3342_v57  ;;  %v3382_v43 = vld [vmem:[%s4680_s1 + $0x1a0] ss:$16 sps:$4 sm:$0xff]   ;;  %v2769_v45 = vrot.slane %v572_v40, 9  ;;  %v585_v46 = vrot.slane %v583_v39, 4  ;;  %v3394_v47 = vld [vmem:[%s4680_s1 + $0x1cc] ss:$16 sps:$4 sm:$0xff]  }
  0x1c   :  { %470 = vmatprep.subr.bf16.mxu0 %v3347_v58  ;;  %523 = vmatprep.subr.bf16.mxu1 %v3350_v61  ;;  %v3389_v48 = vld [vmem:[%s4680_s1 + $0x1c0] ss:$16 sps:$4 sm:$0xff]   ;;  %v3392_v49 = vld [vmem:[%s4680_s1 + $0x1c8] ss:$16 sps:$4 sm:$0xff]   ;;  %v590_v52 = vrot.slane %v3634_v50, 5  ;;  %vm1163_vm8 = vcmask 1045508  }
  0x1d   :  { %v3397_v53 = vld [vmem:[%s4680_s1 + $0x1e4] ss:$16 sps:$4 sm:$0xff]   ;;  %v3400_v56 = vld [vmem:[%s4680_s1 + $0x1ec] ss:$16 sps:$4 sm:$0xff]   ;;  %v584_v57 = vsel %vm3755_vm6, %v2769_v45, %v583_v39  ;;  %v587_v58 = vsel %vm3755_vm6, %v585_v46, %v586_v42  ;;  %v864_v59 = vrot.slane %v76_v29, 5  ;;  %v1174_v61 = vrot.slane %v3634_v50, 6  ;;  %vm3838_vm10 = vmor %vm1162_vm7, %vm1163_vm8 }
  0x1e   :  { %2740 = vmatmul.mubr.msk.bf16.gmra.mrb[4].mxu0 %vm237_vm3, %v2718_v14  ;;  %2742 = vmatmul.mubr.msk.bf16.gmra.mrb[4].mxu1 %vm237_vm3, %v2718_v14  ;;  %v3798_v60 = vld [vmem:[%s4681_s0 + $0xc] sm:$0xe]  ;;  %v865_v62 = vrot.slane %v72_v28, 6  ;;  %v856_v63 = vshrl.u32 %v572_v40, 16  ;;  %v859_v0 = vshll.u32 %v572_v40, 16  ;;  %v2791_v3 = vcombine.low %v584_v57, %v587_v58 }
  0x1f   :  { %471 = vmatpush1.bf16.msra.mxu0 %v3345_v2  ;;  %524 = vmatpush1.bf16.msra.mxu1 %v3348_v5  ;;  %v1167_v2 = vrot.slane %v3587_v24, 6  ;;  %v3395_v29 = vld [vmem:[%s4680_s1 + $0x1e0] ss:$16 sps:$4 sm:$0xff]   ;;  %v592_v4 = vrot.slane %v590_v52, 4  ;;  %v593_v5 = vrot.slane %v3639_v51, 5  ;;  %v2770_v28 = vrot.slane %v3798_v60, 9 }
  0x20   :  { %472 = vmatprep.subr.bf16.mxu0 %v3353_v6  ;;  %525 = vmatprep.subr.bf16.mxu1 %v3356_v8  ;;  %v3398_v6 = vld [vmem:[%s4680_s1 + $0x1e8] ss:$16 sps:$4 sm:$0xff]   ;;  %v3403_v8 = vld [vmem:[%s4680_s1 + $0x204] ss:$16 sps:$4 sm:$0xff]   ;;  %v3406_v51 = vld [vmem:[%s4680_s1 + $0x20c] ss:$16 sps:$4 sm:$0xff]  }
  0x21   :  { %498 = vmatprep.mubr.bf16.mxu0 %v3457_v1  ;;  %551 = vmatprep.mubr.bf16.mxu1 %v3457_v1  ;;  %v850_v7 = vld [vmem:[%s4681_s0 + $0x8] sm:$0x3]  ;;  %vm852_vm9 = vsmask.f32 2304  ;;  %v1176_v9 = vrot.slane %v1174_v61, 4  ;;  %v861_v12 = vrot.slane %v859_v0, 6 }
  0x22   :  { %v3401_v10 = vld [vmem:[%s4680_s1 + $0x200] ss:$16 sps:$4 sm:$0xff]   ;;  %v870_v14 = vshrl.u32 %v850_v7, 16  ;;  %vm853_vm11 = vsmask.f32 6416  ;;  %vm1440_vm13 = vcmask 64512  }
  0x23   :  { %473 = vmatpush1.bf16.msra.mxu0 %v3351_v11  ;;  %526 = vmatpush1.bf16.msra.mxu1 %v3354_v13  ;;  %v858_v11 = vrot.slane %v856_v63, 5  ;;  %v3404_v13 = vld [vmem:[%s4680_s1 + $0x208] ss:$16 sps:$4 sm:$0xff]   ;;  %v3415_v39 = vld [vmem:[%s4680_s1 + $0x244] ss:$16 sps:$4 sm:$0xff]   ;;  %vm3902_vm12 = vmor %vm852_vm9, %vm853_vm11  ;;  %vm1931_vm14 = vcmask 261120  }
  0x24   :  { %474 = vmatprep.subr.bf16.mxu0 %v3359_v15  ;;  %527 = vmatprep.subr.bf16.mxu1 %v3362_v16  ;;  %v873_v15 = vshll.u32 %v850_v7, 16  ;;  %v3834_v16 = vld [vmem:[%s4681_s0 + $0x14] sm:$0x3]  ;;  %v1156_v40 = vld [vmem:[%s4681_s0] sm:$0xc] }
  0x25   :  { %v3418_v42 = vld [vmem:[%s4680_s1 + $0x24c] ss:$16 sps:$4 sm:$0xff]   ;;  %v893_v24 = vshrl.u32 %v3834_v16, 16  ;;  %v896_v58 = vshll.u32 %v3834_v16, 16 }
  0x26   :  { %v1157_v45 = vld [vmem:[%s4681_s0 + $0xc] sm:$0xc] }
  0x27   :  { %475 = vmatpush1.bf16.msra.mxu0 %v3357_v17  ;;  %528 = vmatpush1.bf16.msra.mxu1 %v3360_v18  ;;  %v3409_v18 = vld [vmem:[%s4680_s1 + $0x224] ss:$16 sps:$4 sm:$0xff]   ;;  %v3424_v63 = vld [vmem:[%s4680_s1 + $0x26c] ss:$16 sps:$4 sm:$0xff]  }
  0x28   :  { %728 = vmatprep.subr.bf16.mxu0 %v3365_v19  ;;  %781 = vmatprep.subr.bf16.mxu1 %v3368_v20  ;;  %v591_v19 = vsel %vm3755_vm6, %v2770_v28, %v590_v52  ;;  %v594_v20 = vsel %vm3755_vm6, %v592_v4, %v593_v5  ;;  %v895_v5 = vrot.slane %v893_v24, 5  ;;  %v3427_v28 = vld [vmem:[%s4680_s1 + $0x284] ss:$16 sps:$4 sm:$0xff]   ;;  %v1725_v24 = vld [vmem:[%s4684_s6 + $0x198] sm:$0xff] }
  0x2a   :  { %2765 = vmatmul.mubr.msk.bf16.vlgmr.msra.gmra.mrb[0].mxu0 %vm237_vm3, %v2743_v22  ;;  %2767 = vmatmul.mubr.msk.bf16.vlgmr.msra.gmra.mrb[0].mxu1 %vm237_vm3, %v2743_v22  ;;  %v3850_v22 = vor.u32 %v865_v62, %v864_v59  ;;  %v3421_v62 = vld [vmem:[%s4680_s1 + $0x264] ss:$16 sps:$4 sm:$0xff]  }
  0x2b   :  { %729 = vmatpush1.bf16.msra.mxu0 %v3363_v21  ;;  %782 = vmatpush1.bf16.msra.mxu1 %v3366_v26  ;;  %v1177_v21 = vrot.slane %v3834_v16, 6  ;;  %v3412_v26 = vld [vmem:[%s4680_s1 + $0x22c] ss:$16 sps:$4 sm:$0xff]   ;;  %v3434_v16 = vld [vmem:[%s4680_s1 + $0x2a8] ss:$16 sps:$4 sm:$0xff]  }
  0x2c   :  { %730 = vmatprep.subr.bf16.mxu0 %v3372_v27  ;;  %783 = vmatprep.subr.bf16.mxu1 %v3375_v30  ;;  %v1169_v27 = vrot.slane %v1167_v2, 4  ;;  %v1170_v30 = vrot.slane %v850_v7, 6  ;;  %v868_v41 = vrot.slane %v3850_v22, 4  ;;  %v3430_v7 = vld [vmem:[%s4680_s1 + $0x28c] ss:$16 sps:$4 sm:$0xff]  }
  0x2d   :  { %508 = vmatprep.mubr.bf16.mxu0 %v3457_v1  ;;  %561 = vmatprep.mubr.bf16.mxu1 %v3457_v1 }
  0x2f   :  { %731 = vmatpush1.bf16.msra.mxu0 %v3370_v23  ;;  %784 = vmatpush1.bf16.msra.mxu1 %v3373_v31  ;;  %v862_v23 = vor.u32 %v861_v12, %v858_v11  ;;  %v879_v31 = vshrl.u32 %v3798_v60, 16 }
  0x30   :  { %732 = vmatprep.subr.bf16.mxu0 %v3378_v32  ;;  %785 = vmatprep.subr.bf16.mxu1 %v3381_v33  ;;  %v1178_v32 = vsel %vm3838_vm10, %v1176_v9, %v1177_v21  ;;  %v3407_v33 = vld [vmem:[%s4680_s1 + $0x220] ss:$16 sps:$4 sm:$0xff]   ;;  %v3428_v9 = vld [vmem:[%s4680_s1 + $0x288] ss:$16 sps:$4 sm:$0xff]  }
  0x31   :  { %v863_v46 = vrot.slane %v862_v23, 4  ;;  %v881_v52 = vrot.slane %v879_v31, 5  ;;  %v3443_v23 = vld [vmem:[%s4680_s1 + $0x2e0] ss:$16 sps:$4 sm:$0xff]   ;;  %v3446_v31 = vld [vmem:[%s4680_s1 + $0x2e8] ss:$16 sps:$4 sm:$0xff]  }
  0x32   :  { %2766 = vmatmul.mubr.msk.bf16.gmra.mrb[4].mxu0 %vm237_vm3, %v2744_v37  ;;  %2768 = vmatmul.mubr.msk.bf16.gmra.mrb[4].mxu1 %vm237_vm3, %v2744_v37  ;;  %v882_v37 = vshll.u32 %v3798_v60, 16 }
  0x33   :  { %733 = vmatpush1.bf16.msra.mxu0 %v3376_v34  ;;  %786 = vmatpush1.bf16.msra.mxu1 %v3379_v35  ;;  %v2792_v34 = vcombine.low %v591_v19, %v594_v20  ;;  %v872_v35 = vrot.slane %v870_v14, 5  ;;  %v867_v50 = vsel %vm3902_vm12, %v863_v46, %v3850_v22  ;;  %v3436_v14 = vld [vmem:[%s4680_s1 + $0x2ac] ss:$16 sps:$4 sm:$0xff]   ;;  %v3439_v19 = vld [vmem:[%s4680_s1 + $0x2c4] ss:$16 sps:$4 sm:$0xff]  }
  0x34   :  { %734 = vmatprep.subr.bf16.mxu0 %v3384_v36  ;;  %787 = vmatprep.subr.bf16.mxu1 %v3387_v38  ;;  %v875_v36 = vrot.slane %v873_v15, 6  ;;  %v3410_v38 = vld [vmem:[%s4680_s1 + $0x228] ss:$16 sps:$4 sm:$0xff]   ;;  %v3431_v15 = vld [vmem:[%s4680_s1 + $0x2a0] ss:$16 sps:$4 sm:$0xff]  }
  0x35   :  { %760 = vmatprep.mubr.bf16.mxu0 %v3457_v1  ;;  %813 = vmatprep.mubr.bf16.mxu1 %v3457_v1  ;;  %v3442_v20 = vld [vmem:[%s4680_s1 + $0x2cc] ss:$16 sps:$4 sm:$0xff]   ;;  %v3437_v22 = vld [vmem:[%s4680_s1 + $0x2c0] ss:$16 sps:$4 sm:$0xff]  }
  0x36   :  { %v1674_v46 = vld [vmem:[%s4684_s6] sm:$0xff] }
  0x37   :  { %735 = vmatpush1.bf16.msra.mxu0 %v3382_v43  ;;  %788 = vmatpush1.bf16.msra.mxu1 %v3385_v44  ;;  %v2863_v43 = vrot.slane %v1156_v40, 10  ;;  %v1171_v44 = vsel %vm3838_vm10, %v1169_v27, %v1170_v30  ;;  %v3445_v27 = vld [vmem:[%s4680_s1 + $0x2e4] ss:$16 sps:$4 sm:$0xff]   ;;  %v3448_v30 = vld [vmem:[%s4680_s1 + $0x2ec] ss:$16 sps:$4 sm:$0xff]   ;;  %v4690_v40 = vmov 0.0  }
  0x38   :  { %736 = vmatprep.subr.bf16.mxu0 %v3391_v25  ;;  %789 = vmatprep.subr.bf16.mxu1 %v3394_v47  ;;  %v887_v25 = vrot.slane %v100_v55, 5  ;;  %v888_v47 = vrot.slane %v96_v54, 6  ;;  %v3413_v55 = vld [vmem:[%s4680_s1 + $0x240] ss:$16 sps:$4 sm:$0xff]   ;;  %v3416_v54 = vld [vmem:[%s4680_s1 + $0x248] ss:$16 sps:$4 sm:$0xff]  }
  0x3b   :  { %737 = vmatpush1.bf16.msra.mxu0 %v3389_v48  ;;  %790 = vmatpush1.bf16.msra.mxu1 %v3392_v49  ;;  %v2864_v48 = vrot.slane %v1157_v45, 10  ;;  %v876_v49 = vor.u32 %v875_v36, %v872_v35  ;;  %v3452_v35 = vld [vmem:[%s4680_s1 + $0x308] ss:$16 sps:$4 sm:$0xff]  }
  0x3c   :  { %1034 = vmatprep.subr.bf16.mxu0 %v3397_v53  ;;  %1087 = vmatprep.subr.bf16.mxu1 %v3400_v56  ;;  %v884_v53 = vrot.slane %v882_v37, 6  ;;  %v1168_v56 = vsel %vm3838_vm10, %v2863_v43, %v1167_v2  ;;  %v3419_v2 = vld [vmem:[%s4680_s1 + $0x260] ss:$16 sps:$4 sm:$0xff]   ;;  %v1437_v36 = vld [vmem:[%s4682_s4 + $0x8] sm:$0xff]  ;;  %v1439_v37 = vld [vmem:[%s4682_s4 + $0x18] sm:$0xff] }
  0x3d   :  { %v3908_v59 = vcombine.low %v1168_v56, %v1171_v44  ;;  %v1175_v60 = vsel %vm3838_vm10, %v2864_v48, %v1174_v61  ;;  %v889_v61 = vor.u32 %v888_v47, %v887_v25  ;;  %v1722_v43 = vld [vmem:[%s4684_s6 + $0x180] sm:$0xff]  ;;  %v1723_v45 = vld [vmem:[%s4684_s6 + $0x188] sm:$0xff]  ;;  %v1692_v56 = vld [vmem:[%s4684_s6 + $0x90] sm:$0xff] }
  0x3e   :  { %2813 = vmatmul.mubr.msk.bf16.vlgmr.msra.gmra.mrb[0].mxu0 %vm237_vm3, %v2791_v3  ;;  %2815 = vmatmul.mubr.msk.bf16.vlgmr.msra.gmra.mrb[0].mxu1 %vm237_vm3, %v2791_v3  ;;  %v3920_v0 = vcombine.low %v1175_v60, %v1178_v32  ;;  %v877_v3 = vsel %vm3902_vm12, %v868_v41, %v876_v49  ;;  %v885_v4 = vor.u32 %v884_v53, %v881_v52  ;;  %v3451_v32 = vld [vmem:[%s4680_s1 + $0x304] ss:$16 sps:$4 sm:$0xff]   ;;  %v1435_v41 = vld [vmem:[%s4683_s3] sm:$0x3]  ;;  %v1675_v25 = vld [vmem:[%s4684_s6 + $0x8] sm:$0xff] }
  0x3f   :  { %1035 = vmatpush1.bf16.msra.mxu0 %v3395_v29  ;;  %1088 = vmatpush1.bf16.msra.mxu1 %v3398_v6  ;;  %v3422_v29 = vld [vmem:[%s4680_s1 + $0x268] ss:$16 sps:$4 sm:$0xff]   ;;  %v898_v6 = vrot.slane %v896_v58, 6  ;;  %v891_v11 = vrot.slane %v889_v61, 4  ;;  %v4054_v47 = vpack.c.bf16 %v1723_v45, %v1722_v43  ;;  %v4056_v48 = vpack.c.bf16 %v1675_v25, %v1674_v46  ;;  %v1706_v49 = vld [vmem:[%s4684_s6 + $0x100] sm:$0xff]  ;;  %v1676_v58 = vld [vmem:[%s4684_s6 + $0x10] sm:$0xff] }
  0x40   :  { %1036 = vmatprep.subr.bf16.mxu0 %v3403_v8  ;;  %1089 = vmatprep.subr.bf16.mxu1 %v3406_v51  ;;  %v2837_v8 = vcombine.low %v867_v50, %v877_v3  ;;  %v3425_v51 = vld [vmem:[%s4680_s1 + $0x280] ss:$16 sps:$4 sm:$0xff]   ;;  %v1707_v52 = vld [vmem:[%s4684_s6 + $0x108] sm:$0xff]  ;;  %v1677_v60 = vld [vmem:[%s4684_s6 + $0x18] sm:$0xff] }
  0x41   :  { %770 = vmatprep.mubr.bf16.mxu0 %v3457_v1  ;;  %823 = vmatprep.mubr.bf16.mxu1 %v3457_v1  ;;  %v899_v12 = vor.u32 %v898_v6, %v895_v5  ;;  %v4065_v53 = vpack.c.bf16 %v1707_v52, %v1706_v49  ;;  %v1678_v5 = vld [vmem:[%s4684_s6 + $0x20] sm:$0xff]  ;;  %v1679_v6 = vld [vmem:[%s4684_s6 + $0x28] sm:$0xff]  ;;  %v1684_v43 = vld [vmem:[%s4684_s6 + $0x50] sm:$0xff] }
  0x42   :  { %v1685_v46 = vld [vmem:[%s4684_s6 + $0x58] sm:$0xff]  ;;  %v1716_v25 = vld [vmem:[%s4684_s6 + $0x150] sm:$0xff]  ;;  %v1702_v52 = vld [vmem:[%s4684_s6 + $0xe0] sm:$0xff] }
  0x43   :  { %1037 = vmatpush1.bf16.msra.mxu0 %v3401_v10  ;;  %1090 = vmatpush1.bf16.msra.mxu1 %v3404_v13  ;;  %v886_v10 = vrot.slane %v885_v4, 4  ;;  %v3433_v13 = vld [vmem:[%s4680_s1 + $0x2a4] ss:$16 sps:$4 sm:$0xff]   ;;  %v1727_v4 = vld [vmem:[%s4684_s6 + $0x1a8] sm:$0xff]  ;;  %v1717_v49 = vld [vmem:[%s4684_s6 + $0x158] sm:$0xff] }
  0x44   :  { %1038 = vmatprep.subr.bf16.mxu0 %v3409_v18  ;;  %1091 = vmatprep.subr.bf16.mxu1 %v3412_v26  ;;  %v900_v18 = vsel %vm3902_vm12, %v891_v11, %v899_v12  ;;  %v3440_v26 = vld [vmem:[%s4680_s1 + $0x2c8] ss:$16 sps:$4 sm:$0xff]   ;;  %v1728_v12 = vld [vmem:[%s4684_s6 + $0x1b0] sm:$0xff] }
  0x45   :  { %v890_v17 = vsel %vm3902_vm12, %v886_v10, %v889_v61  ;;  %v1694_v61 = vld [vmem:[%s4684_s6 + $0xa0] sm:$0xff]  ;;  %v1696_v10 = vld [vmem:[%s4684_s6 + $0xb0] sm:$0xff]  ;;  %v1697_v11 = vld [vmem:[%s4684_s6 + $0xb8] sm:$0xff] }
  0x46   :  { %2814 = vmatmul.mubr.msk.bf16.gmra.mrb[4].mxu0 %vm237_vm3, %v2792_v34  ;;  %2816 = vmatmul.mubr.msk.bf16.gmra.mrb[4].mxu1 %vm237_vm3, %v2792_v34  ;;  %v2838_v21 = vcombine.low %v890_v17, %v900_v18  ;;  %v3449_v34 = vld [vmem:[%s4680_s1 + $0x300] ss:$16 sps:$4 sm:$0xff]  }
  0x47   :  { %1039 = vmatpush1.bf16.msra.mxu0 %v3407_v33  ;;  %1092 = vmatpush1.bf16.msra.mxu1 %v3410_v38  ;;  %v3454_v33 = vld [vmem:[%s4680_s1 + $0x30c] ss:$16 sps:$4 sm:$0xff]   ;;  %v1436_v38 = vld [vmem:[%s4682_s4] sm:$0xff] }
  0x48   :  { %1040 = vmatprep.subr.bf16.mxu0 %v3415_v39  ;;  %1093 = vmatprep.subr.bf16.mxu1 %v3418_v42  ;;  %v1438_v39 = vld [vmem:[%s4682_s4 + $0x10] sm:$0xff]  ;;  %v1691_v42 = vld [vmem:[%s4684_s6 + $0x88] sm:$0xff] }
  0x49   :  { %1066 = vmatprep.mubr.bf16.mxu0 %v3457_v1  ;;  %1119 = vmatprep.mubr.bf16.mxu1 %v3457_v1 }
  0x4b   :  { %1041 = vmatpush1.bf16.msra.mxu0 %v3413_v55  ;;  %1094 = vmatpush1.bf16.msra.mxu1 %v3416_v54  ;;  %v1693_v55 = vld [vmem:[%s4684_s6 + $0x98] sm:$0xff]  ;;  %v1724_v54 = vld [vmem:[%s4684_s6 + $0x190] sm:$0xff] }
  0x4c   :  { %1042 = vmatprep.subr.bf16.mxu0 %v3421_v62  ;;  %1095 = vmatprep.subr.bf16.mxu1 %v3424_v63  ;;  %v4079_v57 = vpack.c.bf16 %v1693_v55, %v1692_v56  ;;  %v1708_v62 = vld [vmem:[%s4684_s6 + $0x110] sm:$0xff]  ;;  %v1709_v63 = vld [vmem:[%s4684_s6 + $0x118] sm:$0xff]  ;;  %v1703_v56 = vld [vmem:[%s4684_s6 + $0xe8] sm:$0xff] }
  0x4d   :  { %v4101_v50 = vpack.c.bf16 %v1709_v63, %v1708_v62  ;;  %v1734_v55 = vld [vmem:[%s4684_s6 + $0x1e0] sm:$0xff]  ;;  %v1687_v62 = vld [vmem:[%s4684_s6 + $0x68] sm:$0xff]  ;;  %v4266_v63 = vpack.c.bf16 %v1703_v56, %v1702_v52 }
  0x4f   :  { %1043 = vmatpush1.bf16.msra.mxu0 %v3419_v2  ;;  %1096 = vmatpush1.bf16.msra.mxu1 %v3422_v29  ;;  %v1695_v2 = vld [vmem:[%s4684_s6 + $0xa8] sm:$0xff]  ;;  %v1726_v29 = vld [vmem:[%s4684_s6 + $0x1a0] sm:$0xff] }
  0x50   :  { %1312 = vmatprep.subr.bf16.mxu0 %v3427_v28  ;;  %1365 = vmatprep.subr.bf16.mxu1 %v3430_v7  ;;  %v4115_v3 = vpack.c.bf16 %v1695_v2, %v1694_v61  ;;  %v4126_v28 = vpack.c.bf16 %v1727_v4, %v1726_v29  ;;  %v4128_v7 = vpack.c.bf16 %v1679_v6, %v1678_v5  ;;  %v1718_v2 = vld [vmem:[%s4684_s6 + $0x160] sm:$0xff]  ;;  %v1719_v29 = vld [vmem:[%s4684_s6 + $0x168] sm:$0xff]  ;;  %v1704_v4 = vld [vmem:[%s4684_s6 + $0xf0] sm:$0xff] }
  0x51   :  { %v1705_v5 = vld [vmem:[%s4684_s6 + $0xf8] sm:$0xff]  ;;  %v1736_v6 = vld [vmem:[%s4684_s6 + $0x1f0] sm:$0xff] }
  0x52   :  { %2859 = vmatmul.mubr.msk.bf16.vlgmr.msra.gmra.mrb[0].mxu0 %vm237_vm3, %v2837_v8  ;;  %2861 = vmatmul.mubr.msk.bf16.vlgmr.msra.gmra.mrb[0].mxu1 %vm237_vm3, %v2837_v8  ;;  %v1710_v8 = vld [vmem:[%s4684_s6 + $0x120] sm:$0xff] }
  0x53   :  { %1313 = vmatpush1.bf16.msra.mxu0 %v3425_v51  ;;  %1366 = vmatpush1.bf16.msra.mxu1 %v3428_v9  ;;  %v1711_v51 = vld [vmem:[%s4684_s6 + $0x128] sm:$0xff] }
  0x54   :  { %1314 = vmatprep.subr.bf16.mxu0 %v3433_v13  ;;  %1367 = vmatprep.subr.bf16.mxu1 %v3436_v14  ;;  %v4137_v9 = vpack.c.bf16 %v1711_v51, %v1710_v8  ;;  %v4151_v13 = vpack.c.bf16 %v1697_v11, %v1696_v10  ;;  %v1729_v14 = vld [vmem:[%s4684_s6 + $0x1b8] sm:$0xff]  ;;  %v4292_v10 = vpack.c.bf16 %v1719_v29, %v1718_v2  ;;  %v1688_v11 = vld [vmem:[%s4684_s6 + $0x70] sm:$0xff]  ;;  %v3460_v2 = vmov 1966171168  }
  0x55   :  { %1076 = vmatprep.mubr.bf16.mxu0 %v3457_v1  ;;  %1129 = vmatprep.mubr.bf16.mxu1 %v3457_v1  ;;  %v4162_v17 = vpack.c.bf16 %v1729_v14, %v1728_v12  ;;  %v1737_v8 = vld [vmem:[%s4684_s6 + $0x1f8] sm:$0xff]  ;;  %v4299_v12 = vpack.c.bf16 %v1705_v5, %v1704_v4  ;;  %v1611_v29 = vunpack.c.l.s4 %v3460_v2 }
  0x56   :  { %4711 = vst [vmem:[#allocation3_spill] sm:$0xff] %v4292_v10  ;;  %v4301_v14 = vpack.c.bf16 %v1737_v8, %v1736_v6 }
  0x57   :  { %1315 = vmatpush1.bf16.msra.mxu0 %v3431_v15  ;;  %1368 = vmatpush1.bf16.msra.mxu1 %v3434_v16  ;;  %v1680_v15 = vld [vmem:[%s4684_s6 + $0x30] sm:$0xff]  ;;  %v1681_v16 = vld [vmem:[%s4684_s6 + $0x38] sm:$0xff]  ;;  %4712 = vst [vmem:[#allocation4_spill] sm:$0xff] %v4299_v12 }
  0x58   :  { %1316 = vmatprep.subr.bf16.mxu0 %v3439_v19  ;;  %1369 = vmatprep.subr.bf16.mxu1 %v3442_v20  ;;  %v4164_v18 = vpack.c.bf16 %v1681_v16, %v1680_v15  ;;  %v1712_v19 = vld [vmem:[%s4684_s6 + $0x130] sm:$0xff]  ;;  %v1713_v20 = vld [vmem:[%s4684_s6 + $0x138] sm:$0xff]  ;;  %4713 = vst [vmem:[#allocation5_spill] sm:$0xff] %v4301_v14 }
  0x59   :  { %v1689_v15 = vld [vmem:[%s4684_s6 + $0x78] sm:$0xff]  ;;  %v1720_v16 = vld [vmem:[%s4684_s6 + $0x170] sm:$0xff] }
  0x5a   :  { %2860 = vmatmul.mubr.msk.bf16.gmra.mrb[4].mxu0 %vm237_vm3, %v2838_v21  ;;  %2862 = vmatmul.mubr.msk.bf16.gmra.mrb[4].mxu1 %vm237_vm3, %v2838_v21  ;;  %v1698_v21 = vld [vmem:[%s4684_s6 + $0xc0] sm:$0xff] }
  0x5b   :  { %1317 = vmatpush1.bf16.msra.mxu0 %v3437_v22  ;;  %1370 = vmatpush1.bf16.msra.mxu1 %v3440_v26  ;;  %v4176_v22 = vpack.c.bf16 %v1713_v20, %v1712_v19  ;;  %v1699_v26 = vld [vmem:[%s4684_s6 + $0xc8] sm:$0xff]  ;;  %v1721_v19 = vld [vmem:[%s4684_s6 + $0x178] sm:$0xff]  ;;  %v4314_v20 = vpack.c.bf16 %v1689_v15, %v1688_v11 }
  0x5c   :  { %1318 = vmatprep.subr.bf16.mxu0 %v3445_v27  ;;  %1371 = vmatprep.subr.bf16.mxu1 %v3448_v30  ;;  %v1730_v27 = vld [vmem:[%s4684_s6 + $0x1c0] sm:$0xff]  ;;  %v1731_v30 = vld [vmem:[%s4684_s6 + $0x1c8] sm:$0xff] }
  0x5d   :  { %1344 = vmatprep.mubr.bf16.mxu0 %v3457_v1  ;;  %1397 = vmatprep.mubr.bf16.mxu1 %v3457_v1  ;;  %4714 = vst [vmem:[#allocation6_spill] sm:$0xff] %v4314_v20 }
  0x5f   :  { %1319 = vmatpush1.bf16.msra.mxu0 %v3443_v23  ;;  %1372 = vmatpush1.bf16.msra.mxu1 %v3446_v31  ;;  %v4188_v23 = vpack.c.bf16 %v1699_v26, %v1698_v21  ;;  %v4190_v31 = vpack.c.bf16 %v1731_v30, %v1730_v27  ;;  %v4316_v21 = vpack.c.bf16 %v1721_v19, %v1720_v16  ;;  %v1612_v19 = vunpack.c.0.s8 %v1611_v29 }
  0x60   :  { %1320 = vmatprep.subr.bf16.mxu0 %v3451_v32  ;;  %1373 = vmatprep.subr.bf16.mxu1 %v3454_v33  ;;  %v1682_v32 = vld [vmem:[%s4684_s6 + $0x40] sm:$0xff]  ;;  %v1683_v33 = vld [vmem:[%s4684_s6 + $0x48] sm:$0xff] }
  0x61   :  { %4715 = vst [vmem:[#allocation7_spill] sm:$0xff] %v4316_v21 }
  0x63   :  { %1321 = vmatpush1.bf16.msra.mxu0 %v3449_v34  ;;  %1374 = vmatpush1.bf16.msra.mxu1 %v3452_v35  ;;  %v1714_v34 = vld [vmem:[%s4684_s6 + $0x140] sm:$0xff]  ;;  %v4203_v35 = vpack.c.bf16 %v1683_v33, %v1682_v32 }
  0x64   :  { %1444 = vmatprep.subr.mxu0 %v1437_v36  ;;  %1515 = vmatprep.subr.mxu1 %v1439_v37  ;;  %v1715_v36 = vld [vmem:[%s4684_s6 + $0x148] sm:$0xff]  ;;  %v1700_v37 = vld [vmem:[%s4684_s6 + $0xd0] sm:$0xff] }
  0x66   :  { %2907 = vmatmul.mubr.msk.bf16.vlgmr.msra.gmra.mrb[0].mxu0 %vm237_vm3, %v3908_v59  ;;  %2909 = vmatmul.mubr.msk.bf16.vlgmr.msra.gmra.mrb[0].mxu1 %vm237_vm3, %v3908_v59  ;;  %v4087_v59 = vpack.c.bf16 %v1725_v24, %v1724_v54  ;;  %v4251_v54 = vpack.c.bf16 %v1685_v46, %v1684_v43  ;;  %v4253_v24 = vpack.c.bf16 %v1717_v49, %v1716_v25  ;;  %v1595_v46 = vlaneseq }
  0x67   :  { %1445 = vmatpush1.msra.mxu0 %v1436_v38  ;;  %1516 = vmatpush1.msra.mxu1 %v1438_v39  ;;  %v1701_v38 = vld [vmem:[%s4684_s6 + $0xd8] sm:$0xff]  ;;  %v4216_v39 = vpack.c.bf16 %v1715_v36, %v1714_v34 }
  0x68   :  { %1354 = vmatprep.mubr.bf16.mxu0 %v3457_v1  ;;  %1407 = vmatprep.mubr.bf16.mxu1 %v3457_v1  ;;  %v1690_v1 = vld [vmem:[%s4684_s6 + $0x80] sm:$0xff] }
  0x69   :  { %v4043_v44 = vpack.c.bf16 %v1691_v42, %v1690_v1  ;;  %3092 = vmatprep.subr.bf16.mxu1 %v4054_v47  ;;  %v1732_v1 = vld [vmem:[%s4684_s6 + $0x1d0] sm:$0xff]  ;;  %v1733_v42 = vld [vmem:[%s4684_s6 + $0x1d8] sm:$0xff] }
  0x6a   :  { %v4229_v45 = vpack.c.bf16 %v1733_v42, %v1732_v1  ;;  %v3459_v42 = vmov 1983009808  }
  0x6b   :  { %3060 = vmatprep.subr.bf16.mxu0 %v4043_v44  ;;  %v1593_v43 = vunpack.c.l.s4 %v3459_v42 }
  0x6e   :  { %2908 = vmatmul.mubr.msk.bf16.gmra.mrb[4].mxu0 %vm237_vm3, %v3920_v0  ;;  %2910 = vmatmul.mubr.msk.bf16.gmra.mrb[4].mxu1 %vm237_vm3, %v3920_v0  ;;  %v4099_v0 = vpack.c.bf16 %v1677_v60, %v1676_v58  ;;  %v1735_v58 = vld [vmem:[%s4684_s6 + $0x1e8] sm:$0xff]  ;;  %v1686_v60 = vld [vmem:[%s4684_s6 + $0x60] sm:$0xff] }
  0x6f   :  { %1508 = vmatprep.mubr.f32.mxu0 %v4690_v40  ;;  %1579 = vmatprep.mubr.f32.mxu1 %v4690_v40  ;;  %v4268_v61 = vpack.c.bf16 %v1735_v58, %v1734_v55  ;;  %v4290_v51 = vpack.c.bf16 %v1687_v62, %v1686_v60  ;;  %v1594_v60 = vunpack.c.0.s8 %v1593_v43  ;;  %v1596_v62 = vshrl.u32 %v1595_v46, 7 }
  0x71   :  { %4710 = vst [vmem:[#allocation2_spill] sm:$0xff] %v4290_v51  ;;  %v1597_v6 = vsub.s32 %v1594_v60, %v1596_v62  ;;  %v4331_v43 = vsub.s32 0, %v1596_v62  ;;  %v1624_v2 = vsub.s32 1, %v1596_v62 }
  0x76   :  { %2911 = vmatmul.mubr.msk.f32.vlgmr.msra.gmra.mrb[8].mxu0 %vm1440_vm13, %v1435_v41  ;;  %2912 = vmatmul.mubr.msk.f32.vlgmr.msra.gmra.mrb[8].mxu1 %vm1440_vm13, %v1435_v41  ;;  %v4218_v41 = vpack.c.bf16 %v1701_v38, %v1700_v37 }
  0x77   :  { %3062 = vmatpush3.bf16.msra.mxu0 %v4056_v48  ;;  %3094 = vmatpush3.bf16.msra.mxu1 %v4065_v53 }
  0x78   :  { %3064 = vmatprep.subr.bf16.mxu0 %v4079_v57  ;;  %3096 = vmatprep.subr.bf16.mxu1 %v4087_v59 }
  0x7b   :  { %3066 = vmatpush3.bf16.msra.mxu0 %v4099_v0  ;;  %3098 = vmatpush3.bf16.msra.mxu1 %v4101_v50 }
  0x7c   :  { %3068 = vmatprep.subr.bf16.mxu0 %v4115_v3  ;;  %3100 = vmatprep.subr.bf16.mxu1 %v4126_v28 }
  0x7f   :  { %3070 = vmatpush3.bf16.msra.mxu0 %v4128_v7  ;;  %3102 = vmatpush3.bf16.msra.mxu1 %v4137_v9 }
  0x80   :  { %3072 = vmatprep.subr.bf16.mxu0 %v4151_v13  ;;  %3104 = vmatprep.subr.bf16.mxu1 %v4162_v17 }
  0x83   :  { %3074 = vmatpush3.bf16.msra.mxu0 %v4164_v18  ;;  %3106 = vmatpush3.bf16.msra.mxu1 %v4176_v22 }
  0x84   :  { %3076 = vmatprep.subr.bf16.mxu0 %v4188_v23  ;;  %3108 = vmatprep.subr.bf16.mxu1 %v4190_v31 }
  0x87   :  { %3078 = vmatpush3.bf16.msra.mxu0 %v4203_v35  ;;  %3110 = vmatpush3.bf16.msra.mxu1 %v4216_v39 }
  0x88   :  { %3080 = vmatprep.subr.bf16.mxu0 %v4218_v41  ;;  %3112 = vmatprep.subr.bf16.mxu1 %v4229_v45 }
  0x8b   :  { %3082 = vmatpush3.bf16.msra.mxu0 %v4251_v54  ;;  %3114 = vmatpush3.bf16.msra.mxu1 %v4253_v24 }
  0x8c   :  { %3084 = vmatprep.subr.bf16.mxu0 %v4266_v63  ;;  %3116 = vmatprep.subr.bf16.mxu1 %v4268_v61 }
  0x8f   :  { %3086 = vmatpush3.bf16.msra.mxu0 %v4290_v51  ;;  %3118 = vmatpush3.bf16.msra.mxu1 %v4292_v10  ;;  %v1628_v10 = vsub.s32 2, %v1596_v62 }
  0x90   :  { %3088 = vmatprep.subr.bf16.mxu0 %v4299_v12  ;;  %3120 = vmatprep.subr.bf16.mxu1 %v4301_v14  ;;  %v1615_v14 = vsub.s32 %v1612_v19, %v1596_v62  ;;  %v1632_v12 = vsub.s32 3, %v1596_v62 }
  0x93   :  { %3090 = vmatpush3.bf16.msra.mxu0 %v4314_v20  ;;  %3122 = vmatpush3.bf16.msra.mxu1 %v4316_v21  ;;  %v1434_v21 = vld [vmem:[%s4685_s2] sm:$0xff] }
 0x139   :  { %v1346_v26 = vpop.f32.mrb[0].mxu0  ;;  %v4322_v27 = vpop.f32.mrb[0].mxu1 }
 0x13a   :  { %v1348_v30 = vpop.f32.mrb[1].mxu0  ;;  %v1401_v32 = vpop.f32.mrb[1].mxu1 }
 0x13b   :  { %v1350_v33 = vpop.f32.mrb[2].mxu0  ;;  %v4324_v34 = vpop.f32.mrb[2].mxu1 }
 0x13c   :  { %v1352_v36 = vpop.f32.mrb[3].mxu0  ;;  %v1405_v37 = vpop.f32.mrb[3].mxu1 }
 0x141   :  { %v1356_v38 = vpop.f32.mrb[4].mxu0  ;;  %v4326_v1 = vpop.f32.mrb[4].mxu1 }
 0x142   :  { %v1358_v25 = vpop.f32.mrb[5].mxu0  ;;  %v1411_v49 = vpop.f32.mrb[5].mxu1 }
 0x143   :  { %v1360_v52 = vpop.f32.mrb[6].mxu0  ;;  %v1413_v56 = vpop.f32.mrb[6].mxu1 }
 0x144   :  { %v1362_v55 = vpop.f32.mrb[7].mxu0  ;;  %v1415_v58 = vpop.f32.mrb[7].mxu1 }
 0x149   :  { %v1510_v4 = vpop.f32.mrb[8].mxu0  ;;  %v1581_v5 = vpop.f32.mrb[8].mxu1 }
 0x14a   :  { %v1512_v8 = vpop.f32.mrb[9].mxu0  ;;  %v1583_v11 = vpop.f32.mrb[9].mxu1 }
 0x14b   :  { %v1590_v15 = vcombine.low %v1510_v4, %v1512_v8  ;;  %v1591_v16 = vcombine.low %v1581_v5, %v1583_v11 }
 0x14d   :  { %v1598_v42 = vrot.slane %v1590_v15, %v1597_v6  ;;  %v1605_v40 = vrot.slane %v1591_v16, %v1597_v6 }
 0x14f   :  { %v1606_v20 = vcombine.low %v1598_v42, %v1605_v40 }
 0x151   :  { %v1608_v46 = vadd.f32 %v1606_v20, %v1434_v21 }
 0x153   :  { %v1616_v60 = vrot.slane %v1608_v46, %v1615_v14 }
 0x155   :  { %v1617_v51 = vcombine.high %v1616_v60, %v1616_v60  ;;  %v1621_v4 = vrot.slane %v1616_v60, %v4331_v43  ;;  %v1625_v5 = vrot.slane %v1616_v60, %v1624_v2  ;;  %v1633_v29 = vrot.slane %v1616_v60, %v1632_v12 }
 0x156   :  { %v1629_v8 = vrot.slane %v1616_v60, %v1628_v10 }
 0x157   :  { %v1641_v6 = vrot.slane %v1617_v51, %v1624_v2  ;;  %v4334_v11 = vadd.f32 %v1625_v5, %v1348_v30  ;;  %v4336_v15 = vadd.f32 %v1625_v5, %v1352_v36  ;;  %v1649_v40 = vrot.slane %v1617_v51, %v1632_v12 }
 0x158   :  { %v4338_v16 = vadd.f32 %v1633_v29, %v1401_v32  ;;  %v4340_v19 = vadd.f32 %v1633_v29, %v1405_v37  ;;  %v1637_v20 = vrot.slane %v1617_v51, %v4331_v43  ;;  %v4343_v21 = vadd.f32 %v1621_v4, %v1346_v26 }
 0x159   :  { %v4345_v14 = vadd.f32 %v1641_v6, %v1358_v25  ;;  %v4347_v62 = vadd.f32 %v1641_v6, %v1362_v55  ;;  %v1763_v42 = vadd.f32 %v4336_v15, %v4334_v11  ;;  %v4351_v30 = vadd.f32 %v1649_v40, %v1411_v49 }
 0x15a   :  { %4716 = vst [vmem:[#allocation8_spill] sm:$0xff] %v4338_v16  ;;  %4717 = vst [vmem:[#allocation9_spill] sm:$0xff] %v4340_v19  ;;  %v4353_v36 = vadd.f32 %v1649_v40, %v1415_v58  ;;  %v1781_v12 = vadd.f32 %v4340_v19, %v4338_v16  ;;  %v4357_v32 = vadd.f32 %v1621_v4, %v1350_v33 }
 0x15b   :  { %4718 = vst [vmem:[#allocation10_spill] sm:$0xff] %v4351_v30  ;;  %v4359_v37 = vadd.f32 %v1637_v20, %v1356_v38  ;;  %v1764_v26 = vadd.f32 %v1763_v42, %v4345_v14  ;;  %v4362_v25 = vadd.f32 %v1637_v20, %v1360_v52  ;;  %v1645_v55 = vrot.slane %v1617_v51, %v1628_v10 }
 0x15c   :  { %4719 = vst [vmem:[#allocation11_spill] sm:$0xff] %v4353_v36  ;;  %v4365_v46 = vadd.f32 %v1629_v8, %v4322_v27  ;;  %v1782_v49 = vadd.f32 %v1781_v12, %v4351_v30  ;;  %v1754_v58 = vadd.f32 %v4357_v32, %v4343_v21  ;;  %v4371_v2 = vadd.f32 %v1629_v8, %v4324_v34 }
 0x15d   :  { %v1765_v33 = vadd.f32 %v1764_v26, %v4347_v62  ;;  %v4375_v38 = vadd.f32 %v1645_v55, %v4326_v1  ;;  %v4377_v60 = vadd.f32 %v1645_v55, %v1413_v56 }
 0x15e   :  { %v1783_v51 = vadd.f32 %v1782_v49, %v4353_v36  ;;  %v1755_v10 = vadd.f32 %v1754_v58, %v4359_v37  ;;  %v1772_v27 = vadd.f32 %v4371_v2, %v4365_v46 }
 0x15f   :  { %v1766_v52 = vrot.slane %v1765_v33, 4 }
 0x160   :  { %v1784_v4 = vrot.slane %v1783_v51, 4  ;;  %v1756_v5 = vadd.f32 %v1755_v10, %v4362_v25  ;;  %v1773_v34 = vadd.f32 %v1772_v27, %v4375_v38 }
 0x161   :  { %v1767_v29 = vadd.f32 %v1766_v52, %v1765_v33 }
 0x162   :  { %v1785_v8 = vadd.f32 %v1784_v4, %v1783_v51  ;;  %v1757_v6 = vrot.slane %v1756_v5, 4  ;;  %v1774_v1 = vadd.f32 %v1773_v34, %v4377_v60  ;;  %v1739_v34 = vld [vmem:[%s4686_s5 + $0x8] sm:$0xff] }
 0x163   :  { %v1768_v56 = vrot.slane %v1767_v29, 2 }
 0x164   :  { %v1786_v40 = vrot.slane %v1785_v8, 2  ;;  %v1758_v20 = vadd.f32 %v1757_v6, %v1756_v5  ;;  %v1775_v42 = vrot.slane %v1774_v1, 4  ;;  %v4720_v5 = vmov 0.0  }
 0x165   :  { %v1769_v12 = vadd.f32 %v1768_v56, %v1767_v29  ;;  %v1738_v29 = vld [vmem:[%s4686_s5] sm:$0xff]  ;;  %v1740_v56 = vld [vmem:[%s4686_s5 + $0x10] sm:$0xff] }
 0x166   :  { %v1787_v26 = vadd.f32 %v1786_v40, %v1785_v8  ;;  %v1759_v55 = vrot.slane %v1758_v20, 2  ;;  %v1776_v49 = vadd.f32 %v1775_v42, %v1774_v1  ;;  %v1742_v8 = vld [vmem:[%s4686_s5 + $0x20] sm:$0xff]  ;;  %v1744_v40 = vld [vmem:[%s4686_s5 + $0x30] sm:$0xff]  ;;  %v1747_v42 = vld [vmem:[%s4686_s5 + $0x48] sm:$0xff] }
 0x167   :  { %v1770_v58 = vrot.slane %v1769_v12, 1  ;;  %v4410_v1 = vpack.c.bf16 %v1742_v8, %v1738_v29 }
 0x168   :  { %v1788_v36 = vrot.slane %v1787_v26, 1  ;;  %v1760_v30 = vadd.f32 %v1759_v55, %v1758_v20  ;;  %v1777_v19 = vrot.slane %v1776_v49, 2  ;;  %v4419_v20 = vpack.c.bf16 %v1744_v40, %v1740_v56 }
 0x169   :  { %v1771_v10 = vadd.f32 %v1770_v58, %v1769_v12  ;;  %v1751_v12 = vld [vmem:[%s4686_s5 + $0x68] sm:$0xff]  ;;  %v1746_v58 = vld [vmem:[%s4686_s5 + $0x40] sm:$0xff] }
 0x16a   :  { %v1789_v16 = vadd.f32 %v1788_v36, %v1787_v26  ;;  %v1761_v27 = vrot.slane %v1760_v30, 1  ;;  %v1778_v33 = vadd.f32 %v1777_v19, %v1776_v49  ;;  %v1743_v36 = vld [vmem:[%s4686_s5 + $0x28] sm:$0xff]  ;;  %v1749_v26 = vld [vmem:[%s4686_s5 + $0x58] sm:$0xff]  ;;  %v4433_v55 = vpack.c.bf16 %v1751_v12, %v1747_v42  ;;  %v4727_v12 = vld [vmem:[#allocation8_spill] sm:$0xff] }
 0x16b   :  { %1854 = vmatprep.mubr.f32.mxu0 %v1771_v10  ;;  %v4397_v19 = vpack.c.bf16 %v1743_v36, %v1739_v34  ;;  %v1753_v49 = vld [vmem:[%s4686_s5 + $0x78] sm:$0xff]  ;;  %v1750_v10 = vld [vmem:[%s4686_s5 + $0x60] sm:$0xff] }
 0x16c   :  { %1924 = vmatprep.mubr.f32.mxu1 %v1789_v16  ;;  %v1762_v51 = vadd.f32 %v1761_v27, %v1760_v30  ;;  %v1779_v52 = vrot.slane %v1778_v33, 1  ;;  %v1741_v16 = vld [vmem:[%s4686_s5 + $0x18] sm:$0xff]  ;;  %v4444_v27 = vpack.c.bf16 %v1753_v49, %v1749_v26 }
 0x16d   :  { %v1745_v30 = vld [vmem:[%s4686_s5 + $0x38] sm:$0xff]  ;;  %3124 = vmatprep.subr.bf16.mxu0 %v4397_v19 }
 0x16e   :  { %1855 = vmatmul.mubr.f32.vlgmr.msra.gmra.mrb[10].mxu0 %v1762_v51  ;;  %v1780_v4 = vadd.f32 %v1779_v52, %v1778_v33  ;;  %v4408_v6 = vpack.c.bf16 %v1745_v30, %v1741_v16  ;;  %v4446_v33 = vpack.c.bf16 %v1750_v10, %v1746_v58  ;;  %v1748_v51 = vld [vmem:[%s4686_s5 + $0x50] sm:$0xff]  ;;  %v4728_v49 = vld [vmem:[#allocation9_spill] sm:$0xff] }
 0x16f   :  { %1999 = vmatprep.mubr.f32.mxu0 %v4720_v5  ;;  %3126 = vmatpush1.bf16.msra.mxu0 %v4410_v1  ;;  %v1752_v52 = vld [vmem:[%s4686_s5 + $0x70] sm:$0xff] }
 0x170   :  { %1925 = vmatmul.mubr.f32.vlgmr.msra.gmra.mrb[10].mxu1 %v1780_v4  ;;  %3132 = vmatprep.subr.bf16.mxu1 %v4408_v6  ;;  %v4455_v4 = vpack.c.bf16 %v1752_v52, %v1748_v51  ;;  %v4729_v52 = vld [vmem:[#allocation10_spill] sm:$0xff] }
 0x171   :  { %2070 = vmatprep.mubr.f32.mxu1 %v4720_v5  ;;  %3134 = vmatpush1.bf16.msra.mxu1 %v4419_v20 }
 0x172   :  { %3128 = vmatprep.subr.bf16.mxu0 %v4433_v55  ;;  %3136 = vmatprep.subr.bf16.mxu1 %v4444_v27 }
 0x173   :  { %3130 = vmatpush1.bf16.msra.mxu0 %v4446_v33 }
 0x174   :  { %3140 = vmatprep.subr.bf16.mxu0 %v4043_v44  ;;  %v4721_v44 = vld [vmem:[#allocation2_spill] sm:$0xff] }
 0x175   :  { %3138 = vmatpush1.bf16.msra.mxu1 %v4455_v4 }
 0x176   :  { %3172 = vmatprep.subr.bf16.mxu1 %v4054_v47  ;;  %v4722_v47 = vld [vmem:[#allocation3_spill] sm:$0xff] }
 0x241   :  { %v2951_v34 = vpop.f32.mrb[10].mxu0 }
 0x242   :  { %v2952_v36 = vpop.f32.mrb[11].mxu0 }
 0x243   :  { %v2986_v16 = vpop.f32.mrb[10].mxu1  ;;  %v2953_v30 = vadd.f32 %v2952_v36, %v2951_v34  ;;  %v4730_v36 = vld [vmem:[#allocation11_spill] sm:$0xff] }
 0x244   :  { %v2987_v29 = vpop.f32.mrb[11].mxu1 }
 0x245   :  { %v2988_v8 = vadd.f32 %v2987_v29, %v2986_v16 }
 0x247   :  { %v1927_v56 = vadd.f32 %v2988_v8, %v2953_v30 }
 0x249   :  { %v1930_v40 = vmul.f32 0.001953125, %v1927_v56 }
 0x24b   :  { %2913 = vmatmul.mubr.msk.f32.vlgmr.msra.gmra.mrb[12].mxu0 %vm1931_vm14, %v1930_v40  ;;  %2914 = vmatmul.mubr.msk.f32.vlgmr.msra.gmra.mrb[12].mxu1 %vm1931_vm14, %v1930_v40 }
 0x24c   :  { %3142 = vmatpush3.bf16.msra.mxu0 %v4056_v48  ;;  %3174 = vmatpush3.bf16.msra.mxu1 %v4065_v53  ;;  %v4723_v48 = vld [vmem:[#allocation4_spill] sm:$0xff]  ;;  %v4724_v53 = vld [vmem:[#allocation5_spill] sm:$0xff] }
 0x24d   :  { %3144 = vmatprep.subr.bf16.mxu0 %v4079_v57  ;;  %3176 = vmatprep.subr.bf16.mxu1 %v4087_v59  ;;  %v4725_v57 = vld [vmem:[#allocation6_spill] sm:$0xff]  ;;  %v4726_v59 = vld [vmem:[#allocation7_spill] sm:$0xff] }
 0x250   :  { %3146 = vmatpush3.bf16.msra.mxu0 %v4099_v0  ;;  %3178 = vmatpush3.bf16.msra.mxu1 %v4101_v50 }
 0x251   :  { %3148 = vmatprep.subr.bf16.mxu0 %v4115_v3  ;;  %3180 = vmatprep.subr.bf16.mxu1 %v4126_v28 }
 0x254   :  { %3150 = vmatpush3.bf16.msra.mxu0 %v4128_v7  ;;  %3182 = vmatpush3.bf16.msra.mxu1 %v4137_v9 }
 0x255   :  { %3152 = vmatprep.subr.bf16.mxu0 %v4151_v13  ;;  %3184 = vmatprep.subr.bf16.mxu1 %v4162_v17 }
 0x258   :  { %3154 = vmatpush3.bf16.msra.mxu0 %v4164_v18  ;;  %3186 = vmatpush3.bf16.msra.mxu1 %v4176_v22 }
 0x259   :  { %3156 = vmatprep.subr.bf16.mxu0 %v4188_v23  ;;  %3188 = vmatprep.subr.bf16.mxu1 %v4190_v31 }
 0x25c   :  { %3158 = vmatpush3.bf16.msra.mxu0 %v4203_v35  ;;  %3190 = vmatpush3.bf16.msra.mxu1 %v4216_v39 }
 0x25d   :  { %3160 = vmatprep.subr.bf16.mxu0 %v4218_v41  ;;  %3192 = vmatprep.subr.bf16.mxu1 %v4229_v45 }
 0x260   :  { %3162 = vmatpush3.bf16.msra.mxu0 %v4251_v54  ;;  %3194 = vmatpush3.bf16.msra.mxu1 %v4253_v24 }
 0x261   :  { %3164 = vmatprep.subr.bf16.mxu0 %v4266_v63  ;;  %3196 = vmatprep.subr.bf16.mxu1 %v4268_v61 }
 0x264   :  { %3166 = vmatpush3.bf16.msra.mxu0 %v4721_v44  ;;  %3198 = vmatpush3.bf16.msra.mxu1 %v4722_v47 }
 0x265   :  { %3168 = vmatprep.subr.bf16.mxu0 %v4723_v48  ;;  %3200 = vmatprep.subr.bf16.mxu1 %v4724_v53 }
 0x268   :  { %3170 = vmatpush3.bf16.msra.mxu0 %v4725_v57  ;;  %3202 = vmatpush3.bf16.msra.mxu1 %v4726_v59 }
 0x269   :  { %3204 = vmatprep.subr.bf16.mxu0 %v4397_v19  ;;  %3212 = vmatprep.subr.bf16.mxu1 %v4408_v6 }
 0x31e   :  { %v2001_v0 = vpop.f32.mrb[12].mxu0  ;;  %v2072_v50 = vpop.f32.mrb[12].mxu1 }
 0x31f   :  { %v2080_v3 = vrot.slane %v2001_v0, %v4331_v43  ;;  %v2088_v28 = vrot.slane %v2072_v50, %v4331_v43  ;;  %v2003_v7 = vpop.f32.mrb[13].mxu0  ;;  %v2074_v9 = vpop.f32.mrb[13].mxu1 }
 0x320   :  { %v2084_v13 = vrot.slane %v2003_v7, %v4331_v43  ;;  %v2092_v41 = vrot.slane %v2074_v9, %v4331_v43 }
 0x321   :  { %v4500_v17 = vsub.f32 %v4343_v21, %v2080_v3  ;;  %v4503_v18 = vsub.f32 %v4357_v32, %v2080_v3  ;;  %v4506_v22 = vsub.f32 %v4359_v37, %v2080_v3  ;;  %v4509_v23 = vsub.f32 %v4362_v25, %v2080_v3 }
 0x322   :  { %v4512_v31 = vsub.f32 %v4365_v46, %v2088_v28  ;;  %v4515_v35 = vsub.f32 %v4371_v2, %v2088_v28  ;;  %v4518_v39 = vsub.f32 %v4375_v38, %v2088_v28  ;;  %v4528_v63 = vsub.f32 %v4377_v60, %v2088_v28 }
 0x323   :  { %v2109_v45 = vmul.f32 %v4500_v17, %v4500_v17  ;;  %v2113_v54 = vmul.f32 %v4503_v18, %v4503_v18  ;;  %v2117_v24 = vmul.f32 %v4506_v22, %v4506_v22  ;;  %v2121_v61 = vmul.f32 %v4509_v23, %v4509_v23 }
 0x324   :  { %v2111_v21 = vmul.f32 %v4512_v31, %v4512_v31  ;;  %v2115_v32 = vmul.f32 %v4515_v35, %v4515_v35  ;;  %v2119_v37 = vmul.f32 %v4518_v39, %v4518_v39  ;;  %v4539_v46 = vsub.f32 %v4334_v11, %v2084_v13 }
 0x325   :  { %v2125_v25 = vadd.f32 %v2113_v54, %v2109_v45  ;;  %v4542_v2 = vsub.f32 %v4336_v15, %v2084_v13  ;;  %v4545_v38 = vsub.f32 %v4345_v14, %v2084_v13  ;;  %v4548_v42 = vsub.f32 %v4347_v62, %v2084_v13 }
 0x326   :  { %v2143_v60 = vadd.f32 %v2115_v32, %v2111_v21  ;;  %v4551_v26 = vsub.f32 %v4727_v12, %v2092_v41  ;;  %v4554_v58 = vsub.f32 %v4728_v49, %v2092_v41  ;;  %v2123_v11 = vmul.f32 %v4528_v63, %v4528_v63 }
 0x327   :  { %v2126_v10 = vadd.f32 %v2125_v25, %v2117_v24  ;;  %v2110_v15 = vmul.f32 %v4539_v46, %v4539_v46  ;;  %v2114_v14 = vmul.f32 %v4542_v2, %v4542_v2  ;;  %v2118_v62 = vmul.f32 %v4545_v38, %v4545_v38 }
 0x328   :  { %v2144_v51 = vadd.f32 %v2143_v60, %v2119_v37  ;;  %v4565_v34 = vsub.f32 %v4729_v52, %v2092_v41  ;;  %v4568_v16 = vsub.f32 %v4730_v36, %v2092_v41  ;;  %v2112_v8 = vmul.f32 %v4551_v26, %v4551_v26 }
 0x329   :  { %v2127_v30 = vadd.f32 %v2126_v10, %v2121_v61  ;;  %v2134_v29 = vadd.f32 %v2114_v14, %v2110_v15  ;;  %v2116_v56 = vmul.f32 %v4554_v58, %v4554_v58  ;;  %v2122_v44 = vmul.f32 %v4548_v42, %v4548_v42 }
 0x32a   :  { %v2145_v40 = vadd.f32 %v2144_v51, %v2123_v11  ;;  %v2120_v47 = vmul.f32 %v4565_v34, %v4565_v34  ;;  %v2124_v0 = vmul.f32 %v4568_v16, %v4568_v16 }
 0x32b   :  { %v2152_v48 = vadd.f32 %v2116_v56, %v2112_v8  ;;  %v2135_v53 = vadd.f32 %v2134_v29, %v2118_v62  ;;  %v2128_v57 = vrot.slane %v2127_v30, 4 }
 0x32c   :  { %v2146_v59 = vrot.slane %v2145_v40, 4 }
 0x32d   :  { %v2136_v50 = vadd.f32 %v2135_v53, %v2122_v44  ;;  %v2153_v3 = vadd.f32 %v2152_v48, %v2120_v47  ;;  %v2129_v28 = vadd.f32 %v2128_v57, %v2127_v30  ;;  %v2302_v53 = vld [vmem:[%s4687_s7] sm:$0x1] }
 0x32e   :  { %v2147_v7 = vadd.f32 %v2146_v59, %v2145_v40 }
 0x32f   :  { %v2137_v9 = vrot.slane %v2136_v50, 4  ;;  %v2154_v13 = vadd.f32 %v2153_v3, %v2124_v0  ;;  %v2130_v41 = vrot.slane %v2129_v28, 2 }
 0x330   :  { %v2148_v45 = vrot.slane %v2147_v7, 2 }
 0x331   :  { %v2138_v54 = vadd.f32 %v2137_v9, %v2136_v50  ;;  %v2155_v24 = vrot.slane %v2154_v13, 4  ;;  %v2131_v61 = vadd.f32 %v2130_v41, %v2129_v28 }
 0x332   :  { %v2149_v37 = vadd.f32 %v2148_v45, %v2147_v7 }
 0x333   :  { %v2139_v21 = vrot.slane %v2138_v54, 2  ;;  %v2156_v32 = vadd.f32 %v2155_v24, %v2154_v13  ;;  %v2132_v12 = vrot.slane %v2131_v61, 1 }
 0x334   :  { %v2150_v11 = vrot.slane %v2149_v37, 1 }
 0x335   :  { %v2140_v25 = vadd.f32 %v2139_v21, %v2138_v54  ;;  %v2157_v60 = vrot.slane %v2156_v32, 2  ;;  %v2133_v51 = vadd.f32 %v2132_v12, %v2131_v61 }
 0x336   :  { %v2151_v52 = vadd.f32 %v2150_v11, %v2149_v37 }
 0x337   :  { %v2141_v49 = vrot.slane %v2140_v25, 1  ;;  %v2158_v10 = vadd.f32 %v2157_v60, %v2156_v32 }
 0x339   :  { %v2142_v15 = vadd.f32 %v2141_v49, %v2140_v25  ;;  %v2159_v14 = vrot.slane %v2158_v10, 1 }
 0x33b   :  { %2225 = vmatprep.mubr.f32.mxu0 %v2142_v15  ;;  %v2160_v62 = vadd.f32 %v2159_v14, %v2158_v10 }
 0x33c   :  { %2226 = vmatmul.mubr.f32.vlgmr.msra.gmra.mrb[14].mxu0 %v2133_v51 }
 0x33d   :  { %2295 = vmatprep.mubr.f32.mxu1 %v2160_v62  ;;  %3206 = vmatpush1.bf16.msra.mxu0 %v4410_v1 }
 0x33e   :  { %2296 = vmatmul.mubr.f32.vlgmr.msra.gmra.mrb[14].mxu1 %v2151_v52  ;;  %3208 = vmatprep.subr.bf16.mxu0 %v4433_v55 }
 0x33f   :  { %3214 = vmatpush1.bf16.msra.mxu1 %v4419_v20  ;;  %2373 = vmatprep.mubr.f32.mxu0 %v4720_v5 }
 0x340   :  { %3216 = vmatprep.subr.bf16.mxu1 %v4444_v27  ;;  %2444 = vmatprep.mubr.f32.mxu1 %v4720_v5 }
 0x341   :  { %3210 = vmatpush1.bf16.msra.mxu0 %v4446_v33 }
 0x342   :  { %3220 = vmatprep.subr.bf16.mxu0 %v4397_v19 }
 0x343   :  { %3218 = vmatpush1.bf16.msra.mxu1 %v4455_v4 }
 0x344   :  { %3228 = vmatprep.subr.bf16.mxu1 %v4408_v6  ;;  %v2451_v6 = vld [vmem:[%s4688_s8] sm:$0x1] }
 0x40f   :  { %v3021_v36 = vpop.f32.mrb[14].mxu0 }
 0x410   :  { %v3022_v30 = vpop.f32.mrb[15].mxu0 }
 0x411   :  { %v3056_v29 = vpop.f32.mrb[14].mxu1  ;;  %v3023_v8 = vadd.f32 %v3022_v30, %v3021_v36 }
 0x412   :  { %v3057_v56 = vpop.f32.mrb[15].mxu1 }
 0x413   :  { %v3058_v40 = vadd.f32 %v3057_v56, %v3056_v29 }
 0x415   :  { %v2298_v44 = vadd.f32 %v3058_v40, %v3023_v8 }
 0x417   :  { %v2301_v47 = vmul.f32 0.001953125, %v2298_v44 }
 0x419   :  { %v2303_v48 = vadd.f32 1e-05, %v2301_v47 }
 0x41b   :  { %3455 = vrsqrt.f32 %v2303_v48 }
 0x425   :  { %v3456_v57 = vpop.eup %3455 }
 0x426   :  { %v2305_v19 = vmul.f32 %v3456_v57, %v2302_v53 }
 0x428   :  { %2915 = vmatmul.mubr.msk.f32.vlgmr.msra.gmra.mrb[16].mxu0 %vm1931_vm14, %v2305_v19  ;;  %2916 = vmatmul.mubr.msk.f32.vlgmr.msra.gmra.mrb[16].mxu1 %vm1931_vm14, %v2305_v19 }
 0x429   :  { %3222 = vmatpush1.bf16.msra.mxu0 %v4410_v1  ;;  %3230 = vmatpush1.bf16.msra.mxu1 %v4419_v20 }
 0x42a   :  { %3224 = vmatprep.subr.bf16.mxu0 %v4433_v55  ;;  %3232 = vmatprep.subr.bf16.mxu1 %v4444_v27 }
 0x42b   :  { %2519 = vmatprep.mubr.f32.mxu0 %v4720_v5  ;;  %2590 = vmatprep.mubr.f32.mxu1 %v4720_v5 }
 0x42d   :  { %3226 = vmatpush1.bf16.msra.mxu0 %v4446_v33  ;;  %3234 = vmatpush1.bf16.msra.mxu1 %v4455_v4 }
 0x430   :  { %2917 = vmatmul.mubr.msk.f32.vlgmr.msra.gmra.mrb[18].mxu0 %vm1931_vm14, %v2451_v6  ;;  %2918 = vmatmul.mubr.msk.f32.vlgmr.msra.gmra.mrb[18].mxu1 %vm1931_vm14, %v2451_v6 }
 0x4fb   :  { %v2375_v1 = vpop.f32.mrb[16].mxu0  ;;  %v2446_v20 = vpop.f32.mrb[16].mxu1 }
 0x4fc   :  { %v2377_v55 = vpop.f32.mrb[17].mxu0  ;;  %v2448_v27 = vpop.f32.mrb[17].mxu1  ;;  %v2600_v59 = vrot.slane %v2375_v1, %v4331_v43  ;;  %v2608_v5 = vrot.slane %v2446_v20, %v4331_v43 }
 0x4fd   :  { %v2604_v33 = vrot.slane %v2377_v55, %v4331_v43  ;;  %v2612_v4 = vrot.slane %v2448_v27, %v4331_v43 }
 0x4fe   :  { %v2613_v0 = vmul.f32 %v2600_v59, %v4500_v17  ;;  %v2617_v50 = vmul.f32 %v2600_v59, %v4503_v18  ;;  %v2621_v3 = vmul.f32 %v2600_v59, %v4506_v22  ;;  %v2625_v28 = vmul.f32 %v2600_v59, %v4509_v23 }
 0x4ff   :  { %v2615_v7 = vmul.f32 %v2608_v5, %v4512_v31  ;;  %v2619_v9 = vmul.f32 %v2608_v5, %v4515_v35  ;;  %v2623_v13 = vmul.f32 %v2608_v5, %v4518_v39  ;;  %v2627_v41 = vmul.f32 %v2608_v5, %v4528_v63 }
 0x500   :  { %v2614_v45 = vmul.f32 %v2604_v33, %v4539_v46  ;;  %v2618_v54 = vmul.f32 %v2604_v33, %v4542_v2  ;;  %v2622_v17 = vmul.f32 %v2604_v33, %v4545_v38  ;;  %v2626_v18 = vmul.f32 %v2604_v33, %v4548_v42 }
 0x501   :  { %v2616_v23 = vmul.f32 %v2612_v4, %v4551_v26  ;;  %v2620_v31 = vmul.f32 %v2612_v4, %v4554_v58  ;;  %v2624_v46 = vmul.f32 %v2612_v4, %v4565_v34  ;;  %v2628_v2 = vmul.f32 %v2612_v4, %v4568_v16 }
 0x503   :  { %v2521_v24 = vpop.f32.mrb[18].mxu0  ;;  %v2592_v22 = vpop.f32.mrb[18].mxu1 }
 0x504   :  { %v2632_v35 = vrot.slane %v2521_v24, %v4331_v43  ;;  %v2640_v39 = vrot.slane %v2592_v22, %v4331_v43  ;;  %v2523_v61 = vpop.f32.mrb[19].mxu0  ;;  %v2594_v63 = vpop.f32.mrb[19].mxu1 }
 0x505   :  { %v2636_v38 = vrot.slane %v2523_v61, %v4331_v43  ;;  %v2644_v42 = vrot.slane %v2594_v63, %v4331_v43 }
 0x506   :  { %v2645_v21 = vadd.f32 %v2632_v35, %v2613_v0  ;;  %v2649_v32 = vadd.f32 %v2632_v35, %v2617_v50  ;;  %v2653_v37 = vadd.f32 %v2632_v35, %v2621_v3  ;;  %v2657_v26 = vadd.f32 %v2632_v35, %v2625_v28 }
 0x507   :  { %v2647_v25 = vadd.f32 %v2640_v39, %v2615_v7  ;;  %v2651_v58 = vadd.f32 %v2640_v39, %v2619_v9  ;;  %v2655_v60 = vadd.f32 %v2640_v39, %v2623_v13  ;;  %v2659_v12 = vadd.f32 %v2640_v39, %v2627_v41 }
 0x508   :  { %v2661_v49 = vmax.f32 %v2645_v21, 0.0  ;;  %v2665_v10 = vmax.f32 %v2649_v32, 0.0  ;;  %v2669_v11 = vmax.f32 %v2653_v37, 0.0  ;;  %v2673_v15 = vmax.f32 %v2657_v26, 0.0 }
 0x509   :  { %v2663_v14 = vmax.f32 %v2647_v25, 0.0  ;;  %v2667_v34 = vmax.f32 %v2651_v58, 0.0  ;;  %v2671_v51 = vmax.f32 %v2655_v60, 0.0  ;;  %v2675_v16 = vmax.f32 %v2659_v12, 0.0 }
 0x50a   :  { %2677 = vst [vmem:[%s4689_s9] sm:$0xff] %v2661_v49  ;;  %2681 = vst [vmem:[%s4689_s9 + $0x20] sm:$0xff] %v2665_v10  ;;  %v2646_v43 = vadd.f32 %v2636_v38, %v2614_v45  ;;  %v2650_v62 = vadd.f32 %v2636_v38, %v2618_v54  ;;  %v2654_v52 = vadd.f32 %v2636_v38, %v2622_v17 }
 0x50b   :  { %2685 = vst [vmem:[%s4689_s9 + $0x40] sm:$0xff] %v2669_v11  ;;  %2689 = vst [vmem:[%s4689_s9 + $0x60] sm:$0xff] %v2673_v15  ;;  %v2658_v36 = vadd.f32 %v2636_v38, %v2626_v18  ;;  %v2648_v30 = vadd.f32 %v2644_v42, %v2616_v23  ;;  %v2652_v29 = vadd.f32 %v2644_v42, %v2620_v31 }
 0x50c   :  { %2679 = vst [vmem:[%s4689_s9 + $0x10] sm:$0xff] %v2663_v14  ;;  %2683 = vst [vmem:[%s4689_s9 + $0x30] sm:$0xff] %v2667_v34  ;;  %v2656_v8 = vadd.f32 %v2644_v42, %v2624_v46  ;;  %v2660_v56 = vadd.f32 %v2644_v42, %v2628_v2  ;;  %v2662_v40 = vmax.f32 %v2646_v43, 0.0  ;;  %v2666_v44 = vmax.f32 %v2650_v62, 0.0 }
 0x50d   :  { %2687 = vst [vmem:[%s4689_s9 + $0x50] sm:$0xff] %v2671_v51  ;;  %2691 = vst [vmem:[%s4689_s9 + $0x70] sm:$0xff] %v2675_v16  ;;  %v2670_v47 = vmax.f32 %v2654_v52, 0.0  ;;  %v2674_v48 = vmax.f32 %v2658_v36, 0.0  ;;  %v2664_v53 = vmax.f32 %v2648_v30, 0.0  ;;  %v2668_v57 = vmax.f32 %v2652_v29, 0.0 }
 0x50e   :  { %v2672_v19 = vmax.f32 %v2656_v8, 0.0  ;;  %v2676_v6 = vmax.f32 %v2660_v56, 0.0  ;;  %2678 = vst [vmem:[%s4689_s9 + $0x8] sm:$0xff] %v2662_v40  ;;  %2682 = vst [vmem:[%s4689_s9 + $0x28] sm:$0xff] %v2666_v44 }
 0x50f   :  { %2686 = vst [vmem:[%s4689_s9 + $0x48] sm:$0xff] %v2670_v47  ;;  %2690 = vst [vmem:[%s4689_s9 + $0x68] sm:$0xff] %v2674_v48 }
 0x510   :  { %2680 = vst [vmem:[%s4689_s9 + $0x18] sm:$0xff] %v2664_v53  ;;  %2684 = vst [vmem:[%s4689_s9 + $0x38] sm:$0xff] %v2668_v57 }
 0x511   :  { %2688 = vst [vmem:[%s4689_s9 + $0x58] sm:$0xff] %v2672_v19  ;;  %2692 = vst [vmem:[%s4689_s9 + $0x78] sm:$0xff] %v2676_v6 }

</bundles_post_ra>
